<compile_context>
chip_gen: v7x
topology: tpu7x:2x2x1
jax: 0.10.0
libtpu: 0.0.40
codegen_flags: <defaults>
</compile_context>

<pallas_src>
import jax
import jax.numpy as jnp
from jax.experimental import pallas as pl
from jax.experimental.pallas import tpu as pltpu


# ----------------------------------------------------------------------------
# Packed-slab layout (weights + biases in one bf16 array, 16-row aligned).
# ----------------------------------------------------------------------------
def _pad16(n):
    return ((n + 15) // 16) * 16


def _slab_layout(obs_dim, act_dim, hidden):
    h = hidden
    r_w1o = 0                               # W1 rows for obs features  [obs, H]
    r_w1a = r_w1o + _pad16(obs_dim)         # W1 rows for act features  [act, H]
    r_w2 = r_w1a + _pad16(act_dim)          # W2                        [H, H]
    r_wqa = r_w2 + _pad16(h)                # fused q1a|q2a             [H, 2H]
    r_wqb = r_wqa + _pad16(h)               # block-diag q1b/q2b        [2H, 2]
    r_b = r_wqb + _pad16(2 * h)             # 4 bias rows
    rows = _pad16(r_b + 4)
    return dict(w1o=r_w1o, w1a=r_w1a, w2=r_w2, wqa=r_wqa, wqb=r_wqb, b=r_b,
                rows=rows)


def pack_params(params, obs_dim, act_dim, hidden):
    """Pack the 12 parameter tensors (weights + biases) into one bf16 slab."""
    h = hidden
    lay = _slab_layout(obs_dim, act_dim, h)
    w = jnp.zeros((lay["rows"], 2 * h), jnp.float32)
    w = w.at[lay["w1o"]:lay["w1o"] + obs_dim, 0:h].set(params["w1"][:obs_dim])
    w = w.at[lay["w1a"]:lay["w1a"] + act_dim, 0:h].set(params["w1"][obs_dim:])
    w = w.at[lay["w2"]:lay["w2"] + h, 0:h].set(params["w2"])
    w = w.at[lay["wqa"]:lay["wqa"] + h, 0:h].set(params["wq1a"])
    w = w.at[lay["wqa"]:lay["wqa"] + h, h:2 * h].set(params["wq2a"])
    w = w.at[lay["wqb"]:lay["wqb"] + h, 0:1].set(params["wq1b"])        # block-
    w = w.at[lay["wqb"] + h:lay["wqb"] + 2 * h, 1:2].set(params["wq2b"])  # diag
    w = w.at[lay["b"] + 0, 0:h].set(params["b1"][0])
    w = w.at[lay["b"] + 1, 0:h].set(params["b2"][0])
    w = w.at[lay["b"] + 2, 0:h].set(params["bq1a"][0])
    w = w.at[lay["b"] + 2, h:2 * h].set(params["bq2a"][0])
    w = w.at[lay["b"] + 3, 0].set(params["bq1b"][0, 0])
    w = w.at[lay["b"] + 3, 1].set(params["bq2b"][0, 0])
    return w.astype(jnp.bfloat16)


# ----------------------------------------------------------------------------
# Pallas kernel factory: 2 GCN layers + fused q1/q2 heads on one row tile.
# ----------------------------------------------------------------------------
def make_critic_kernel(obs_dim, act_dim, hidden):
    h = hidden
    L = _slab_layout(obs_dim, act_dim, hidden)

    def kernel(obs_ref, act_ref, adj_ref, w_ref, q_ref):
        adj = adj_ref[...]          # [TM, TM] bf16, resident across grid steps
        obs = obs_ref[...]          # [TM, obs_dim] bf16
        act = act_ref[...]          # [TM, act_dim] bf16

        # Static, 16-row-aligned slices of the resident parameter slab.
        w1o = w_ref[L["w1o"]:L["w1o"] + obs_dim, 0:h]
        w1a = w_ref[L["w1a"]:L["w1a"] + act_dim, 0:h]
        w2 = w_ref[L["w2"]:L["w2"] + h, 0:h]
        wqa = w_ref[L["wqa"]:L["wqa"] + h, 0:2 * h]
        wqb = w_ref[L["wqb"]:L["wqb"] + 2 * h, 0:2]
        b1 = w_ref[L["b"] + 0:L["b"] + 1, 0:h].astype(jnp.float32)
        b2 = w_ref[L["b"] + 1:L["b"] + 2, 0:h].astype(jnp.float32)
        bqa = w_ref[L["b"] + 2:L["b"] + 3, 0:2 * h].astype(jnp.float32)
        bqb = w_ref[L["b"] + 3:L["b"] + 4, 0:2].astype(jnp.float32)

        # ---- GCN layer 1: relu( Â (x W1) + b1 ) = relu( (Â x) W1 + b1 )
        # aggregate-first (lower-FLOP) order, with x split into obs|act parts
        a_obs = jnp.dot(adj, obs,
                        preferred_element_type=jnp.float32).astype(jnp.bfloat16)
        a_act = jnp.dot(adj, act,
                        preferred_element_type=jnp.float32).astype(jnp.bfloat16)
        h1 = (jnp.dot(a_obs, w1o, preferred_element_type=jnp.float32)
              + jnp.dot(a_act, w1a, preferred_element_type=jnp.float32))
        h1 = jnp.maximum(h1 + b1, 0.0).astype(jnp.bfloat16)

        # ---- GCN layer 2: relu( Â (h1 W2) + b2 ) ----
        hw = jnp.dot(h1, w2,
                     preferred_element_type=jnp.float32).astype(jnp.bfloat16)
        h2 = jnp.maximum(
            jnp.dot(adj, hw, preferred_element_type=jnp.float32) + b2,
            0.0).astype(jnp.bfloat16)

        # ---- fused q1/q2 heads: Linear -> ReLU -> (block-diag) Linear ----
        z = jnp.maximum(
            jnp.dot(h2, wqa, preferred_element_type=jnp.float32) + bqa,
            0.0).astype(jnp.bfloat16)
        q_ref[...] = jnp.dot(z, wqb, preferred_element_type=jnp.float32) + bqb

    return kernel


# ----------------------------------------------------------------------------
# Glue: dense PyG gcn_norm + single resident adjacency tile (built ONCE).
# ----------------------------------------------------------------------------
def gcn_norm_dense(edge_index, num_nodes):
    """Dense D^{-1/2} (A + I) D^{-1/2}, messages src -> tgt (PyG gcn_norm)."""
    src, tgt = edge_index[0], edge_index[1]
    adj = jnp.zeros((num_nodes, num_nodes), jnp.float32).at[tgt, src].add(1.0)
    adj = adj + jnp.eye(num_nodes, dtype=jnp.float32)
    deg = adj.sum(axis=1)
    dinv_sqrt = jnp.where(deg > 0, 1.0 / jnp.sqrt(deg), 0.0)
    return dinv_sqrt[:, None] * adj * dinv_sqrt[None, :]


def build_adj_tile(edge_index, num_nodes, tile_rows):
    """One [tile_rows, tile_rows] diagonal block of the block-diagonal batched
    adjacency (all blocks are identical since every graph shares edge_index and
    tile_rows % num_nodes == 0).  Built once, stays resident in the kernel."""
    assert tile_rows % num_nodes == 0, (
        "tile_rows must be a multiple of the per-graph node count so no graph "
        "straddles a row-tile boundary")
    adj = gcn_norm_dense(edge_index, num_nodes)
    reps = tile_rows // num_nodes
    return jnp.kron(jnp.eye(reps, dtype=jnp.float32), adj).astype(jnp.bfloat16)


def pick_num_row_tiles(total_rows, nodes_per_graph):
    """1 tile (single grid step) on single-TC chips; 2 parallel tiles on v7x."""
    try:
        kind = jax.devices()[0].device_kind.lower()
    except Exception:
        kind = ""
    want = 2 if ("v7" in kind or "7x" in kind) else 1
    while want > 1 and (total_rows % want != 0
                        or (total_rows // want) % nodes_per_graph != 0):
        want -= 1
    return want


# ----------------------------------------------------------------------------
# Wrapper
# ----------------------------------------------------------------------------
def critic_h2g_maac_forward(obs, action, adj_tile, w_slab):
    """Batched forward for graphs stacked along rows (M = BATCH * N).

    obs: [M, obs_dim]   action: [M, act_dim]
    adj_tile: [tm, tm]  one diagonal block of the GCN-normalized block-diag
                        adjacency (tm divides M, tm % N == 0), bf16
    w_slab:   packed bf16 parameter slab from pack_params()
    Returns (q1, q2), each [M, 1] float32.
    """
    m, obs_dim = obs.shape
    act_dim = action.shape[1]
    hidden = w_slab.shape[1] // 2
    lay = _slab_layout(obs_dim, act_dim, hidden)
    assert w_slab.shape == (lay["rows"], 2 * hidden)

    tm = adj_tile.shape[0]
    assert adj_tile.shape == (tm, tm)
    assert m % tm == 0, "adjacency tile rows must divide the batched row count"
    grid = (m // tm,)

    obs = obs.astype(jnp.bfloat16)
    action = action.astype(jnp.bfloat16)
    adj_tile = adj_tile.astype(jnp.bfloat16)
    w_slab = w_slab.astype(jnp.bfloat16)

    q = pl.pallas_call(
        make_critic_kernel(obs_dim, act_dim, hidden),
        out_shape=jax.ShapeDtypeStruct((m, 2), jnp.float32),
        grid_spec=pltpu.PrefetchScalarGridSpec(
            num_scalar_prefetch=0,
            grid=grid,
            in_specs=[
                pl.BlockSpec((tm, obs_dim), lambda i: (i, 0)),   # obs rows
                pl.BlockSpec((tm, act_dim), lambda i: (i, 0)),   # act rows
                pl.BlockSpec((tm, tm), lambda i: (0, 0)),        # resident adj
                pl.BlockSpec(w_slab.shape, lambda i: (0, 0)),    # resident W+b
            ],
            out_specs=pl.BlockSpec((tm, 2), lambda i: (i, 0)),
        ),
        compiler_params=pltpu.CompilerParams(
            dimension_semantics=("parallel",)),
    )(obs, action, adj_tile, w_slab)

    return q[:, 0:1], q[:, 1:2]


# ----------------------------------------------------------------------------
# Deterministic parameter init (PyTorch-style uniform(-1/sqrt(fan_in), +))
# ----------------------------------------------------------------------------
def init_params(key, in_dim, hidden_dim):
    def lin(key, fan_in, fan_out):
        kw, kb = jax.random.split(key)
        bound = 1.0 / jnp.sqrt(fan_in)
        w = jax.random.uniform(kw, (fan_in, fan_out), jnp.float32, -bound, bound)
        b = jax.random.uniform(kb, (1, fan_out), jnp.float32, -bound, bound)
        return w, b

    keys = jax.random.split(key, 6)
    w1, b1 = lin(keys[0], in_dim, hidden_dim)       # gnn1
    w2, b2 = lin(keys[1], hidden_dim, hidden_dim)   # gnn2
    wq1a, bq1a = lin(keys[2], hidden_dim, hidden_dim)
    wq1b, bq1b = lin(keys[3], hidden_dim, 1)
    wq2a, bq2a = lin(keys[4], hidden_dim, hidden_dim)
    wq2b, bq2b = lin(keys[5], hidden_dim, 1)
    return dict(w1=w1, b1=b1, w2=w2, b2=b2,
                wq1a=wq1a, bq1a=bq1a, wq1b=wq1b, bq1b=bq1b,
                wq2a=wq2a, bq2a=bq2a, wq2b=wq2b, bq2b=bq2b)


# ----------------------------------------------------------------------------
# Pure-JAX per-graph f32 reference (mirrors the PyTorch module exactly)
# ----------------------------------------------------------------------------
def reference_forward(obs, action, edge_index, params):
    n = obs.shape[0]
    x = jnp.concatenate([obs, action], axis=1)
    adj = gcn_norm_dense(edge_index, n)
    h = jax.nn.relu(adj @ (x @ params["w1"]) + params["b1"])
    h = jax.nn.relu(adj @ (h @ params["w2"]) + params["b2"])
    z1 = jax.nn.relu(h @ params["wq1a"] + params["bq1a"])
    q1 = z1 @ params["wq1b"] + params["bq1b"]
    z2 = jax.nn.relu(h @ params["wq2a"] + params["bq2a"])
    q2 = z2 @ params["wq2b"] + params["bq2b"]
    return q1, q2


if __name__ == "__main__":
    N = 8            # agents / graph nodes per graph
    OBS_DIM = 12
    ACT_DIM = 4
    HIDDEN = 32
    BATCH = 32       # graphs batched into one kernel call -> M = 256 rows
    M = BATCH * N

    key = jax.random.PRNGKey(0)
    k_obs, k_act, k_par = jax.random.split(key, 3)
    obs_b = jax.random.normal(k_obs, (BATCH, N, OBS_DIM), jnp.float32)
    act_b = jax.random.normal(k_act, (BATCH, N, ACT_DIM), jnp.float32)

    # Bidirectional ring graph over the N agents (shared across the batch).
    src = jnp.concatenate([jnp.arange(N), (jnp.arange(N) + 1) % N])
    tgt = jnp.concatenate([(jnp.arange(N) + 1) % N, jnp.arange(N)])
    edge_index = jnp.stack([src, tgt]).astype(jnp.int32)   # [2, 2N]

    params = init_params(k_par, OBS_DIM + ACT_DIM, HIDDEN)

    # Hoisted out of the hot path: one resident adjacency tile + one packed
    # parameter slab, both static across training steps.
    num_tiles = pick_num_row_tiles(M, N)      # 1 on v5e/v6e, 2 on v7x
    tm = M // num_tiles
    assert M % tm == 0 and tm % N == 0
    adj_tile = build_adj_tile(edge_index, N, tm)              # [tm, tm] bf16
    w_slab = pack_params(params, OBS_DIM, ACT_DIM, HIDDEN)    # bf16 slab

    fwd = jax.jit(critic_h2g_maac_forward)
    q1, q2 = fwd(obs_b.reshape(M, OBS_DIM), act_b.reshape(M, ACT_DIM),
                 adj_tile, w_slab)
    jax.block_until_ready((q1, q2))

    assert q1.shape == (M, 1) and q2.shape == (M, 1)
    assert bool(jnp.all(jnp.isfinite(q1))) and bool(jnp.all(jnp.isfinite(q2)))

    # Correctness check against the per-graph pure-JAX f32 reference
    # (bf16 MXU operands with f32 accumulation -> small, bounded error).
    ref_q1, ref_q2 = jax.vmap(
        lambda o, a: reference_forward(o, a, edge_index, params))(obs_b, act_b)
    ref_q1 = ref_q1.reshape(M, 1)
    ref_q2 = ref_q2.reshape(M, 1)
    err = max(float(jnp.max(jnp.abs(q1 - ref_q1))),
              float(jnp.max(jnp.abs(q2 - ref_q2))))
    assert err < 2e-2, f"max abs error vs reference: {err}"

    print("KERNEL_OK")
</pallas_src>

<mosaic_0001>
module attributes {stable_mosaic.version = 11 : i64} {
  func.func @kernel(%arg0: i32, %arg1: memref<256x12xbf16, #tpu.memory_space<vmem>>, %arg2: memref<256x4xbf16, #tpu.memory_space<vmem>>, %arg3: memref<256x256xbf16, #tpu.memory_space<vmem>>, %arg4: memref<176x64xbf16, #tpu.memory_space<vmem>>, %arg5: memref<256x2xf32, #tpu.memory_space<vmem>>) attributes {dimension_semantics = [#tpu.dimension_semantics<parallel>], iteration_bounds = array<i64: 1>, scalar_prefetch = 0 : i64, scratch_operands = 0 : i64, tpu.core_type = #tpu.core_type<tc>, window_params = [{transform_indices = @transform_0, window_bounds = array<i64: 256, 12>}, {transform_indices = @transform_1, window_bounds = array<i64: 256, 4>}, {pipeline_mode = #tpu.pipeline_mode<synchronous>, transform_indices = @transform_2, window_bounds = array<i64: 256, 256>}, {pipeline_mode = #tpu.pipeline_mode<synchronous>, transform_indices = @transform_3, window_bounds = array<i64: 176, 64>}, {transform_indices = @transform_4, window_bounds = array<i64: 256, 2>}]} {
    %c0 = arith.constant 0 : index
    %c0_0 = arith.constant 0 : index
    %0 = vector.load %arg3[%c0, %c0_0] : memref<256x256xbf16, #tpu.memory_space<vmem>>, vector<256x256xbf16>
    %c0_1 = arith.constant 0 : index
    %c0_2 = arith.constant 0 : index
    %1 = vector.load %arg1[%c0_1, %c0_2] : memref<256x12xbf16, #tpu.memory_space<vmem>>, vector<256x12xbf16>
    %c0_3 = arith.constant 0 : index
    %c0_4 = arith.constant 0 : index
    %2 = vector.load %arg2[%c0_3, %c0_4] : memref<256x4xbf16, #tpu.memory_space<vmem>>, vector<256x4xbf16>
    %c0_5 = arith.constant 0 : index
    %c0_6 = arith.constant 0 : index
    %3 = vector.load %arg4[%c0_5, %c0_6] : memref<176x64xbf16, #tpu.memory_space<vmem>>, vector<12x32xbf16>
    %c16 = arith.constant 16 : index
    %c0_7 = arith.constant 0 : index
    %4 = vector.load %arg4[%c16, %c0_7] : memref<176x64xbf16, #tpu.memory_space<vmem>>, vector<4x32xbf16>
    %c32 = arith.constant 32 : index
    %c0_8 = arith.constant 0 : index
    %5 = vector.load %arg4[%c32, %c0_8] : memref<176x64xbf16, #tpu.memory_space<vmem>>, vector<32x32xbf16>
    %c64 = arith.constant 64 : index
    %c0_9 = arith.constant 0 : index
    %6 = vector.load %arg4[%c64, %c0_9] : memref<176x64xbf16, #tpu.memory_space<vmem>>, vector<32x64xbf16>
    %c96 = arith.constant 96 : index
    %c0_10 = arith.constant 0 : index
    %7 = vector.load %arg4[%c96, %c0_10] : memref<176x64xbf16, #tpu.memory_space<vmem>>, vector<64x2xbf16>
    %c160 = arith.constant 160 : index
    %c0_11 = arith.constant 0 : index
    %8 = vector.load %arg4[%c160, %c0_11] : memref<176x64xbf16, #tpu.memory_space<vmem>>, vector<1x32xbf16>
    %9 = arith.extf %8 : vector<1x32xbf16> to vector<1x32xf32>
    %c161 = arith.constant 161 : index
    %c0_12 = arith.constant 0 : index
    %10 = vector.load %arg4[%c161, %c0_12] : memref<176x64xbf16, #tpu.memory_space<vmem>>, vector<1x32xbf16>
    %11 = arith.extf %10 : vector<1x32xbf16> to vector<1x32xf32>
    %c162 = arith.constant 162 : index
    %c0_13 = arith.constant 0 : index
    %12 = vector.load %arg4[%c162, %c0_13] : memref<176x64xbf16, #tpu.memory_space<vmem>>, vector<1x64xbf16>
    %13 = arith.extf %12 : vector<1x64xbf16> to vector<1x64xf32>
    %c163 = arith.constant 163 : index
    %c0_14 = arith.constant 0 : index
    %14 = vector.load %arg4[%c163, %c0_14] : memref<176x64xbf16, #tpu.memory_space<vmem>>, vector<1x2xbf16>
    %15 = arith.extf %14 : vector<1x2xbf16> to vector<1x2xf32>
    %cst = arith.constant dense<0.000000e+00> : vector<256x12xf32>
    %16 = tpu.matmul %0, %1, %cst {dimension_numbers = #tpu.dot_dimension_numbers<[1], [0], [0], [1], [0, 0, 1, 1], [], []>} : vector<256x256xbf16>, vector<256x12xbf16>, vector<256x12xf32> -> vector<256x12xf32>
    %17 = arith.truncf %16 : vector<256x12xf32> to vector<256x12xbf16>
    %cst_15 = arith.constant dense<0.000000e+00> : vector<256x4xf32>
    %18 = tpu.matmul %0, %2, %cst_15 {dimension_numbers = #tpu.dot_dimension_numbers<[1], [0], [0], [1], [0, 0, 1, 1], [], []>} : vector<256x256xbf16>, vector<256x4xbf16>, vector<256x4xf32> -> vector<256x4xf32>
    %19 = arith.truncf %18 : vector<256x4xf32> to vector<256x4xbf16>
    %cst_16 = arith.constant dense<0.000000e+00> : vector<256x32xf32>
    %20 = tpu.matmul %17, %3, %cst_16 {dimension_numbers = #tpu.dot_dimension_numbers<[1], [0], [0], [1], [0, 0, 1, 1], [], []>} : vector<256x12xbf16>, vector<12x32xbf16>, vector<256x32xf32> -> vector<256x32xf32>
    %cst_17 = arith.constant dense<0.000000e+00> : vector<256x32xf32>
    %21 = tpu.matmul %19, %4, %cst_17 {dimension_numbers = #tpu.dot_dimension_numbers<[1], [0], [0], [1], [0, 0, 1, 1], [], []>} : vector<256x4xbf16>, vector<4x32xbf16>, vector<256x32xf32> -> vector<256x32xf32>
    %22 = arith.addf %20, %21 : vector<256x32xf32>
    %23 = vector.broadcast %9 : vector<1x32xf32> to vector<256x32xf32>
    %24 = arith.addf %22, %23 : vector<256x32xf32>
    %cst_18 = arith.constant 0.000000e+00 : f32
    %25 = vector.broadcast %cst_18 : f32 to vector<256x32xf32>
    %26 = arith.maximumf %24, %25 : vector<256x32xf32>
    %27 = arith.truncf %26 : vector<256x32xf32> to vector<256x32xbf16>
    %cst_19 = arith.constant dense<0.000000e+00> : vector<256x32xf32>
    %28 = tpu.matmul %27, %5, %cst_19 {dimension_numbers = #tpu.dot_dimension_numbers<[1], [0], [0], [1], [0, 0, 1, 1], [], []>} : vector<256x32xbf16>, vector<32x32xbf16>, vector<256x32xf32> -> vector<256x32xf32>
    %29 = arith.truncf %28 : vector<256x32xf32> to vector<256x32xbf16>
    %cst_20 = arith.constant dense<0.000000e+00> : vector<256x32xf32>
    %30 = tpu.matmul %0, %29, %cst_20 {dimension_numbers = #tpu.dot_dimension_numbers<[1], [0], [0], [1], [0, 0, 1, 1], [], []>} : vector<256x256xbf16>, vector<256x32xbf16>, vector<256x32xf32> -> vector<256x32xf32>
    %31 = vector.broadcast %11 : vector<1x32xf32> to vector<256x32xf32>
    %32 = arith.addf %30, %31 : vector<256x32xf32>
    %cst_21 = arith.constant 0.000000e+00 : f32
    %33 = vector.broadcast %cst_21 : f32 to vector<256x32xf32>
    %34 = arith.maximumf %32, %33 : vector<256x32xf32>
    %35 = arith.truncf %34 : vector<256x32xf32> to vector<256x32xbf16>
    %cst_22 = arith.constant dense<0.000000e+00> : vector<256x64xf32>
    %36 = tpu.matmul %35, %6, %cst_22 {dimension_numbers = #tpu.dot_dimension_numbers<[1], [0], [0], [1], [0, 0, 1, 1], [], []>} : vector<256x32xbf16>, vector<32x64xbf16>, vector<256x64xf32> -> vector<256x64xf32>
    %37 = vector.broadcast %13 : vector<1x64xf32> to vector<256x64xf32>
    %38 = arith.addf %36, %37 : vector<256x64xf32>
    %cst_23 = arith.constant 0.000000e+00 : f32
    %39 = vector.broadcast %cst_23 : f32 to vector<256x64xf32>
    %40 = arith.maximumf %38, %39 : vector<256x64xf32>
    %41 = arith.truncf %40 : vector<256x64xf32> to vector<256x64xbf16>
    %cst_24 = arith.constant dense<0.000000e+00> : vector<256x2xf32>
    %42 = tpu.matmul %41, %7, %cst_24 {dimension_numbers = #tpu.dot_dimension_numbers<[1], [0], [0], [1], [0, 0, 1, 1], [], []>} : vector<256x64xbf16>, vector<64x2xbf16>, vector<256x2xf32> -> vector<256x2xf32>
    %43 = vector.broadcast %15 : vector<1x2xf32> to vector<256x2xf32>
    %44 = arith.addf %42, %43 : vector<256x2xf32>
    %c0_25 = arith.constant 0 : index
    %c0_26 = arith.constant 0 : index
    %45 = vector.load %arg5[%c0_25, %c0_26] : memref<256x2xf32, #tpu.memory_space<vmem>>, vector<256x2xf32>
    tpu.vector_store %arg5[%c0_25, %c0_26], %44 {strides = array<i32>} : memref<256x2xf32, #tpu.memory_space<vmem>>, vector<256x2xf32>,
    return
  }
  func.func @transform_0(%arg0: i32) -> (i32, i32) {
    %c0_i32 = arith.constant 0 : i32
    %c0_i32_0 = arith.constant 0 : i32
    return %arg0, %c0_i32 : i32, i32
  }
  func.func @transform_1(%arg0: i32) -> (i32, i32) {
    %c0_i32 = arith.constant 0 : i32
    %c0_i32_0 = arith.constant 0 : i32
    return %arg0, %c0_i32 : i32, i32
  }
  func.func @transform_2(%arg0: i32) -> (i32, i32) {
    %c0_i32 = arith.constant 0 : i32
    %c0_i32_0 = arith.constant 0 : i32
    %c0_i32_1 = arith.constant 0 : i32
    return %c0_i32, %c0_i32_0 : i32, i32
  }
  func.func @transform_3(%arg0: i32) -> (i32, i32) {
    %c0_i32 = arith.constant 0 : i32
    %c0_i32_0 = arith.constant 0 : i32
    %c0_i32_1 = arith.constant 0 : i32
    return %c0_i32, %c0_i32_0 : i32, i32
  }
  func.func @transform_4(%arg0: i32) -> (i32, i32) {
    %c0_i32 = arith.constant 0 : i32
    %c0_i32_0 = arith.constant 0 : i32
    return %arg0, %c0_i32 : i32, i32
  }
}

</mosaic_0001>

<bundles_post_ra>
// kernel: critic_h2g_maac_forward.1
= control target key start
LH: loop header
LB: loop body
LE: loop exit
PB: predicated region body
PF: predicated region fallthrough
CT: control target
= control target key end

     0   :  { %vm892_vm0 = vcmask 1041408   ;;  %vm1111_vm1 = vcmask 1045504   ;;  %vm843_vm2 = vcmask 31744   ;;  %vm1062_vm3 = vcmask 97280   ;;  %s4184_s0 = inlined_call_operand.vmem [shape: bf16[256,12], index: 0, kind: input, shape index: {}]   ;;  %s4185_s2 = inlined_call_operand.vmem [shape: bf16[256,256], index: 2, kind: input, shape index: {}]   ;;  %s4186_s1 = inlined_call_operand.vmem [shape: bf16[256,4], index: 1, kind: input, shape index: {}]   ;;  %s4187_s3 = inlined_call_operand.vmem [shape: bf16[176,64], index: 3, kind: input, shape index: {}]   ;;  %s4188_s4 = inlined_call_operand.vmem [shape: f32[256,2], index: 4, kind: output, shape index: {}]  }
   0x1   :  { %v3168_v0 = vld [vmem:[%s4184_s0 + $0x40] sm:$0xff]   ;;  %v3170_v2 = vld [vmem:[%s4184_s0 + $0x48] sm:$0xff]   ;;  %v3172_v4 = vld [vmem:[%s4184_s0 + $0x50] sm:$0xff]   ;;  %vm1372_vm4 = vcmask 261120   ;;  %vm2112_vm5 = vcmask 523264   ;;  %vm2322_vm6 = vcmask 15360  }
   0x2   :  { %v3169_v1 = vld [vmem:[%s4184_s0] sm:$0xff]   ;;  %3118 = vmatprep.subr.bf16.mxu1 %v3168_v0  ;;  %2512 = vmatprep.subr.bf16.mxu0 %v3168_v0  ;;  %v3171_v3 = vld [vmem:[%s4184_s0 + $0x8] sm:$0xff]   ;;  %v3173_v5 = vld [vmem:[%s4184_s0 + $0x10] sm:$0xff]   ;;  %v1276_v0 = vlaneseq }
   0x3   :  { %3126 = vmatpush3.bf16.msra.mxu1 %v3169_v1  ;;  %2513 = vmatpush3.bf16.msra.mxu0 %v3169_v1  ;;  %v3174_v6 = vld [vmem:[%s4184_s0 + $0x58] sm:$0xff]   ;;  %v3176_v8 = vld [vmem:[%s4184_s0 + $0x60] sm:$0xff]   ;;  %v3178_v10 = vld [vmem:[%s4184_s0 + $0x68] sm:$0xff]  }
   0x4   :  { %3119 = vmatprep.subr.bf16.mxu1 %v3170_v2  ;;  %2514 = vmatprep.subr.bf16.mxu0 %v3170_v2  ;;  %v3175_v7 = vld [vmem:[%s4184_s0 + $0x18] sm:$0xff]   ;;  %v3177_v9 = vld [vmem:[%s4184_s0 + $0x20] sm:$0xff]   ;;  %v3179_v12 = vld [vmem:[%s4184_s0 + $0x28] sm:$0xff]  }
   0x5   :  { %v3350_v11 = vld [vmem:[%s4185_s2 + $0xc4] ss:$8 sps:$4 sm:$0xff]   ;;  %v3180_v13 = vld [vmem:[%s4184_s0 + $0x70] sm:$0xff]   ;;  %v3182_v15 = vld [vmem:[%s4184_s0 + $0x78] sm:$0xff]  }
   0x6   :  { %521 = vmatprep.mubr.bf16.mxu1 %v3350_v11  ;;  %v3181_v14 = vld [vmem:[%s4184_s0 + $0x30] sm:$0xff]   ;;  %v3183_v16 = vld [vmem:[%s4184_s0 + $0x38] sm:$0xff]   ;;  %v3187_v17 = vld [vmem:[%s4186_s1 + $0x40] sm:$0xff]  }
   0x7   :  { %3127 = vmatpush3.bf16.msra.mxu1 %v3171_v3  ;;  %2515 = vmatpush3.bf16.msra.mxu0 %v3171_v3  ;;  %v3374_v18 = vld [vmem:[%s4185_s2 + $0xc0] ss:$8 sps:$4 sm:$0xff]   ;;  %v3382_v20 = vld [vmem:[%s4185_s2 + $0xd4] ss:$8 sps:$4 sm:$0xff]   ;;  %v3395_v23 = vld [vmem:[%s4185_s2 + $0xd0] ss:$8 sps:$4 sm:$0xff]  }
   0x8   :  { %3120 = vmatprep.subr.bf16.mxu1 %v3172_v4  ;;  %2516 = vmatprep.subr.bf16.mxu0 %v3172_v4  ;;  %v3188_v19 = vld [vmem:[%s4186_s1] sm:$0xff]   ;;  %v3189_v21 = vld [vmem:[%s4186_s1 + $0x48] sm:$0xff]   ;;  %v3194_v24 = vld [vmem:[%s4186_s1 + $0x50] sm:$0xff]   ;;  %v3544_v4 = vshrl.u32 %v1276_v0, 7 }
   0x9   :  { %v3190_v22 = vld [vmem:[%s4186_s1 + $0x8] sm:$0xff]   ;;  %v3195_v25 = vld [vmem:[%s4186_s1 + $0x10] sm:$0xff]   ;;  %v3196_v26 = vld [vmem:[%s4186_s1 + $0x58] sm:$0xff]  }
   0xa   :  { %v3214_v27 = vld [vmem:[%s4185_s2 + $0x4] ss:$8 sps:$4 sm:$0xff]   ;;  %v3212_v29 = vld [vmem:[%s4185_s2] ss:$8 sps:$4 sm:$0xff]   ;;  %v3215_v30 = vld [vmem:[%s4185_s2 + $0x14] ss:$8 sps:$4 sm:$0xff]  }
   0xb   :  { %3128 = vmatpush3.bf16.msra.mxu1 %v3173_v5  ;;  %2517 = vmatpush3.bf16.msra.mxu0 %v3173_v5  ;;  %v3412_v28 = vld [vmem:[%s4185_s2 + $0xe4] ss:$8 sps:$4 sm:$0xff]   ;;  %v3197_v31 = vld [vmem:[%s4186_s1 + $0x18] sm:$0xff]   ;;  %v3431_v33 = vld [vmem:[%s4185_s2 + $0xe0] ss:$8 sps:$4 sm:$0xff]  }
   0xc   :  { %3121 = vmatprep.subr.bf16.mxu1 %v3174_v6  ;;  %2518 = vmatprep.subr.bf16.mxu0 %v3174_v6  ;;  %v3201_v32 = vld [vmem:[%s4186_s1 + $0x60] sm:$0xff]   ;;  %v3203_v35 = vld [vmem:[%s4186_s1 + $0x68] sm:$0xff]   ;;  %v3442_v36 = vld [vmem:[%s4185_s2 + $0xf4] ss:$8 sps:$4 sm:$0xff]  }
   0xd   :  { %425 = vmatprep.mubr.bf16.mxu0 %v3214_v27  ;;  %v3202_v34 = vld [vmem:[%s4186_s1 + $0x20] sm:$0xff]   ;;  %v3217_v37 = vld [vmem:[%s4185_s2 + $0x10] ss:$8 sps:$4 sm:$0xff]   ;;  %v3204_v39 = vld [vmem:[%s4186_s1 + $0x28] sm:$0xff]  }
   0xe   :  { %v3218_v38 = vld [vmem:[%s4185_s2 + $0x24] ss:$8 sps:$4 sm:$0xff]   ;;  %v3208_v40 = vld [vmem:[%s4186_s1 + $0x70] sm:$0xff]   ;;  %v3220_v43 = vld [vmem:[%s4185_s2 + $0x20] ss:$8 sps:$4 sm:$0xff]  }
   0xf   :  { %3129 = vmatpush3.bf16.msra.mxu1 %v3175_v7  ;;  %2519 = vmatpush3.bf16.msra.mxu0 %v3175_v7  ;;  %v3461_v41 = vld [vmem:[%s4185_s2 + $0xf0] ss:$8 sps:$4 sm:$0xff]   ;;  %v3221_v45 = vld [vmem:[%s4185_s2 + $0x34] ss:$8 sps:$4 sm:$0xff]   ;;  %v3224_v48 = vld [vmem:[%s4185_s2 + $0x44] ss:$8 sps:$4 sm:$0xff]  }
  0x10   :  { %3122 = vmatprep.subr.bf16.mxu1 %v3176_v8  ;;  %2520 = vmatprep.subr.bf16.mxu0 %v3176_v8  ;;  %v3209_v42 = vld [vmem:[%s4186_s1 + $0x30] sm:$0xff]   ;;  %v3210_v44 = vld [vmem:[%s4186_s1 + $0x78] sm:$0xff]   ;;  %v3226_v49 = vld [vmem:[%s4185_s2 + $0x40] ss:$8 sps:$4 sm:$0xff]   ;;  %v1600_v8 = vsub.s32 1, %v3544_v4 }
  0x11   :  { %v3211_v46 = vld [vmem:[%s4186_s1 + $0x38] sm:$0xff]   ;;  %v3230_v52 = vld [vmem:[%s4185_s2 + $0x64] ss:$8 sps:$4 sm:$0xff]   ;;  %v3232_v53 = vld [vmem:[%s4185_s2 + $0x60] ss:$8 sps:$4 sm:$0xff]  }
  0x12   :  { %v3223_v47 = vld [vmem:[%s4185_s2 + $0x30] ss:$8 sps:$4 sm:$0xff]   ;;  %v3227_v50 = vld [vmem:[%s4185_s2 + $0x54] ss:$8 sps:$4 sm:$0xff]   ;;  %v3236_v56 = vld [vmem:[%s4185_s2 + $0x84] ss:$8 sps:$4 sm:$0xff]  }
  0x13   :  { %3130 = vmatpush3.bf16.msra.mxu1 %v3177_v9  ;;  %2521 = vmatpush3.bf16.msra.mxu0 %v3177_v9  ;;  %v3229_v51 = vld [vmem:[%s4185_s2 + $0x50] ss:$8 sps:$4 sm:$0xff]   ;;  %v3233_v54 = vld [vmem:[%s4185_s2 + $0x74] ss:$8 sps:$4 sm:$0xff]   ;;  %v3238_v57 = vld [vmem:[%s4185_s2 + $0x80] ss:$8 sps:$4 sm:$0xff]  }
  0x14   :  { %3123 = vmatprep.subr.bf16.mxu1 %v3178_v10  ;;  %2522 = vmatprep.subr.bf16.mxu0 %v3178_v10  ;;  %v3235_v55 = vld [vmem:[%s4185_s2 + $0x70] ss:$8 sps:$4 sm:$0xff]   ;;  %v3239_v58 = vld [vmem:[%s4185_s2 + $0x94] ss:$8 sps:$4 sm:$0xff]   ;;  %v3242_v60 = vld [vmem:[%s4185_s2 + $0xa4] ss:$8 sps:$4 sm:$0xff]  }
  0x15   :  { %v3241_v59 = vld [vmem:[%s4185_s2 + $0x90] ss:$8 sps:$4 sm:$0xff]   ;;  %v3244_v61 = vld [vmem:[%s4185_s2 + $0xa0] ss:$8 sps:$4 sm:$0xff]   ;;  %v3245_v62 = vld [vmem:[%s4185_s2 + $0xb4] ss:$8 sps:$4 sm:$0xff]  }
  0x16   :  { %v3247_v63 = vld [vmem:[%s4185_s2 + $0xb0] ss:$8 sps:$4 sm:$0xff]   ;;  %v116_v1 = vld [vmem:[%s4187_s3 + $0x8] sm:$0x3]  ;;  %v2086_v9 = vsub.s32 3, %v3544_v4 }
  0x17   :  { %3131 = vmatpush3.bf16.msra.mxu1 %v3179_v12  ;;  %2523 = vmatpush3.bf16.msra.mxu0 %v3179_v12  ;;  %v3537_v2 = vld [vmem:[%s4187_s3 + $0x50] sm:$0x1]  ;;  %v3542_v3 = vld [vmem:[%s4187_s3 + $0x50] sm:$0x2]  ;;  %v894_v5 = vsel %vm892_vm0, %v116_v1, 0 }
  0x18   :  { %3124 = vmatprep.subr.bf16.mxu1 %v3180_v13  ;;  %2524 = vmatprep.subr.bf16.mxu0 %v3180_v13  ;;  %v4190_v6 = vunpack.c.l.bf16 %v3537_v2  ;;  %v4189_v7 = vunpack.c.l.bf16 %v3542_v3 }
  0x1a   :  { %v3554_v10 = vrot.slane %v4190_v6, %v1600_v8 }
  0x1b   :  { %3132 = vmatpush3.bf16.msra.mxu1 %v3181_v14  ;;  %2525 = vmatpush3.bf16.msra.mxu0 %v3181_v14 }
  0x1c   :  { %3125 = vmatprep.subr.bf16.mxu1 %v3182_v15  ;;  %2526 = vmatprep.subr.bf16.mxu0 %v3182_v15 }
  0x1f   :  { %3133 = vmatpush3.bf16.msra.mxu1 %v3183_v16  ;;  %2527 = vmatpush3.bf16.msra.mxu0 %v3183_v16 }
  0x20   :  { %2624 = vmatprep.subr.bf16.mxu1 %v3187_v17  ;;  %3166 = vmatprep.subr.msk.bf16.mxu0 %vm892_vm0, %v116_v1 }
  0x22   :  { %522 = vmatmul.mubr.bf16.vlgmr.msra.gmra.mrb[0].mxu1 %v3374_v18  ;;  %426 = vmatmul.mubr.bf16.vlgmr.msra.gmra.mrb[0].mxu0 %v3212_v29 }
  0x23   :  { %2625 = vmatpush3.bf16.msra.mxu1 %v3188_v19  ;;  %529 = vmatprep.mubr.bf16.mxu1 %v3382_v20 }
  0x24   :  { %2626 = vmatprep.subr.bf16.mxu1 %v3189_v21  ;;  %433 = vmatprep.mubr.bf16.mxu0 %v3215_v30 }
  0x25   :  { %2939 = vmatpush3.bf16.msra.mxu0 %v894_v5 }
  0x27   :  { %2627 = vmatpush3.bf16.msra.mxu1 %v3190_v22  ;;  %v3574_v22 = vld [vmem:[%s4187_s3] sm:$0x3f]  }
  0x28   :  { %2628 = vmatprep.subr.bf16.mxu1 %v3194_v24  ;;  %3167 = vmatprep.subr.msk.bf16.mxu0 %vm1111_vm1, %v3574_v22 }
  0x2a   :  { %530 = vmatmul.mubr.bf16.gmra.mrb[4].mxu1 %v3395_v23  ;;  %434 = vmatmul.mubr.bf16.gmra.mrb[4].mxu0 %v3217_v37 }
  0x2b   :  { %2629 = vmatpush3.bf16.msra.mxu1 %v3195_v25  ;;  %537 = vmatprep.mubr.bf16.mxu1 %v3412_v28 }
  0x2c   :  { %2630 = vmatprep.subr.bf16.mxu1 %v3196_v26  ;;  %441 = vmatprep.mubr.bf16.mxu0 %v3218_v38 }
  0x2f   :  { %2631 = vmatpush3.bf16.msra.mxu1 %v3197_v31 }
  0x30   :  { %2632 = vmatprep.subr.bf16.mxu1 %v3201_v32 }
  0x32   :  { %538 = vmatmul.mubr.bf16.gmra.mrb[8].mxu1 %v3431_v33  ;;  %442 = vmatmul.mubr.bf16.gmra.mrb[8].mxu0 %v3220_v43 }
  0x33   :  { %2633 = vmatpush3.bf16.msra.mxu1 %v3202_v34  ;;  %545 = vmatprep.mubr.bf16.mxu1 %v3442_v36 }
  0x34   :  { %2634 = vmatprep.subr.bf16.mxu1 %v3203_v35  ;;  %449 = vmatprep.mubr.bf16.mxu0 %v3221_v45 }
  0x37   :  { %2635 = vmatpush3.bf16.msra.mxu1 %v3204_v39 }
  0x38   :  { %2636 = vmatprep.subr.bf16.mxu1 %v3208_v40 }
  0x3a   :  { %546 = vmatmul.mubr.bf16.gmra.mrb[12].mxu1 %v3461_v41  ;;  %450 = vmatmul.mubr.bf16.gmra.mrb[12].mxu0 %v3223_v47 }
  0x3b   :  { %2637 = vmatpush3.bf16.msra.mxu1 %v3209_v42  ;;  %698 = vmatprep.mubr.bf16.mxu1 %v3214_v27 }
  0x3c   :  { %2638 = vmatprep.subr.bf16.mxu1 %v3210_v44  ;;  %457 = vmatprep.mubr.bf16.mxu0 %v3224_v48 }
  0x3f   :  { %2639 = vmatpush3.bf16.msra.mxu1 %v3211_v46 }
  0x42   :  { %699 = vmatmul.mubr.bf16.vlgmr.msra.gmra.mrb[16].mxu1 %v3212_v29  ;;  %458 = vmatmul.mubr.bf16.gmra.mrb[16].mxu0 %v3226_v49 }
  0x43   :  { %706 = vmatprep.mubr.bf16.mxu1 %v3215_v30  ;;  %465 = vmatprep.mubr.bf16.mxu0 %v3227_v50 }
  0x4a   :  { %707 = vmatmul.mubr.bf16.gmra.mrb[20].mxu1 %v3217_v37  ;;  %466 = vmatmul.mubr.bf16.gmra.mrb[20].mxu0 %v3229_v51 }
  0x4b   :  { %714 = vmatprep.mubr.bf16.mxu1 %v3218_v38  ;;  %473 = vmatprep.mubr.bf16.mxu0 %v3230_v52 }
  0x52   :  { %715 = vmatmul.mubr.bf16.gmra.mrb[24].mxu1 %v3220_v43  ;;  %474 = vmatmul.mubr.bf16.gmra.mrb[24].mxu0 %v3232_v53 }
  0x53   :  { %722 = vmatprep.mubr.bf16.mxu1 %v3221_v45  ;;  %481 = vmatprep.mubr.bf16.mxu0 %v3233_v54 }
  0x5a   :  { %723 = vmatmul.mubr.bf16.gmra.mrb[28].mxu1 %v3223_v47  ;;  %482 = vmatmul.mubr.bf16.gmra.mrb[28].mxu0 %v3235_v55 }
  0x5b   :  { %730 = vmatprep.mubr.bf16.mxu1 %v3224_v48  ;;  %489 = vmatprep.mubr.bf16.mxu0 %v3236_v56 }
  0x62   :  { %731 = vmatmul.mubr.bf16.gmra.mrb[32].mxu1 %v3226_v49  ;;  %490 = vmatmul.mubr.bf16.gmra.mrb[32].mxu0 %v3238_v57 }
  0x63   :  { %738 = vmatprep.mubr.bf16.mxu1 %v3227_v50  ;;  %497 = vmatprep.mubr.bf16.mxu0 %v3239_v58 }
  0x6a   :  { %739 = vmatmul.mubr.bf16.gmra.mrb[36].mxu1 %v3229_v51  ;;  %498 = vmatmul.mubr.bf16.gmra.mrb[36].mxu0 %v3241_v59 }
  0x6b   :  { %746 = vmatprep.mubr.bf16.mxu1 %v3230_v52  ;;  %505 = vmatprep.mubr.bf16.mxu0 %v3242_v60 }
  0x72   :  { %747 = vmatmul.mubr.bf16.gmra.mrb[40].mxu1 %v3232_v53  ;;  %506 = vmatmul.mubr.bf16.gmra.mrb[40].mxu0 %v3244_v61 }
  0x73   :  { %754 = vmatprep.mubr.bf16.mxu1 %v3233_v54  ;;  %513 = vmatprep.mubr.bf16.mxu0 %v3245_v62 }
  0x7a   :  { %755 = vmatmul.mubr.bf16.gmra.mrb[44].mxu1 %v3235_v55  ;;  %514 = vmatmul.mubr.bf16.gmra.mrb[44].mxu0 %v3247_v63 }
  0x7b   :  { %762 = vmatprep.mubr.bf16.mxu1 %v3236_v56 }
  0x82   :  { %763 = vmatmul.mubr.bf16.gmra.mrb[48].mxu1 %v3238_v57 }
  0x83   :  { %770 = vmatprep.mubr.bf16.mxu1 %v3239_v58 }
  0x8a   :  { %771 = vmatmul.mubr.bf16.gmra.mrb[52].mxu1 %v3241_v59 }
  0x8b   :  { %778 = vmatprep.mubr.bf16.mxu1 %v3242_v60 }
  0x92   :  { %779 = vmatmul.mubr.bf16.gmra.mrb[56].mxu1 %v3244_v61 }
  0x93   :  { %786 = vmatprep.mubr.bf16.mxu1 %v3245_v62 }
  0x9a   :  { %787 = vmatmul.mubr.bf16.gmra.mrb[60].mxu1 %v3247_v63 }
  0x9b   :  { %794 = vmatprep.mubr.bf16.mxu1 %v3350_v11  ;;  %v3558_v11 = vrot.slane %v4189_v7, %v2086_v9 }
  0xa2   :  { %795 = vmatmul.mubr.bf16.gmra.mrb[64].mxu1 %v3374_v18 }
  0xa3   :  { %802 = vmatprep.mubr.bf16.mxu1 %v3382_v20 }
  0xaa   :  { %803 = vmatmul.mubr.bf16.gmra.mrb[68].mxu1 %v3395_v23 }
  0xab   :  { %810 = vmatprep.mubr.bf16.mxu1 %v3412_v28 }
  0xb2   :  { %811 = vmatmul.mubr.bf16.gmra.mrb[72].mxu1 %v3431_v33 }
  0xb3   :  { %818 = vmatprep.mubr.bf16.mxu1 %v3442_v36 }
  0xba   :  { %819 = vmatmul.mubr.bf16.gmra.mrb[76].mxu1 %v3461_v41 }
  0xf5   :  { %v2600_v12 = vpop.f32.mrb[0].mxu1  ;;  %v2528_v19 = vpop.f32.mrb[0].mxu0 }
  0xf6   :  { %v2601_v13 = vpop.f32.mrb[1].mxu1  ;;  %v2529_v21 = vpop.f32.mrb[1].mxu0 }
  0xf7   :  { %v3565_v14 = vadd.f32 %v2601_v13, %v2600_v12  ;;  %v2603_v15 = vpop.f32.mrb[2].mxu1  ;;  %v3576_v24 = vadd.f32 %v2529_v21, %v2528_v19  ;;  %v2531_v25 = vpop.f32.mrb[2].mxu0 }
  0xf8   :  { %v2604_v16 = vpop.f32.mrb[3].mxu1  ;;  %v2532_v28 = vpop.f32.mrb[3].mxu0 }
  0xf9   :  { %v3567_v17 = vadd.f32 %v2604_v16, %v2603_v15  ;;  %v3582_v30 = vadd.f32 %v2532_v28, %v2531_v25 }
  0xfb   :  { %v554_v32 = vpack.c.bf16 %v3582_v30, %v3576_v24 }
  0xfd   :  { %v2606_v20 = vpop.f32.mrb[4].mxu1  ;;  %v2534_v34 = vpop.f32.mrb[4].mxu0 }
  0xfe   :  { %v2607_v23 = vpop.f32.mrb[5].mxu1  ;;  %v2535_v36 = vpop.f32.mrb[5].mxu0 }
  0xff   :  { %v3578_v26 = vadd.f32 %v2607_v23, %v2606_v20  ;;  %v2609_v27 = vpop.f32.mrb[6].mxu1  ;;  %v3590_v38 = vadd.f32 %v2535_v36, %v2534_v34  ;;  %v2537_v39 = vpop.f32.mrb[6].mxu0 }
 0x100   :  { %v2610_v29 = vpop.f32.mrb[7].mxu1  ;;  %v2538_v42 = vpop.f32.mrb[7].mxu0 }
 0x101   :  { %v3584_v31 = vadd.f32 %v2610_v29, %v2609_v27  ;;  %v3594_v44 = vadd.f32 %v2538_v42, %v2537_v39 }
 0x103   :  { %v555_v46 = vpack.c.bf16 %v3594_v44, %v3590_v38  ;;  %v4195_v44 = vpack.c.bf16 %v3567_v17, %v3565_v14  ;;  %v4199_v14 = vunpack.c.l.bf16 %v3537_v2 }
 0x105   :  { %v2612_v35 = vpop.f32.mrb[8].mxu1  ;;  %v2540_v48 = vpop.f32.mrb[8].mxu0 }
 0x106   :  { %v2613_v37 = vpop.f32.mrb[9].mxu1  ;;  %v2541_v50 = vpop.f32.mrb[9].mxu0 }
 0x107   :  { %v3592_v40 = vadd.f32 %v2613_v37, %v2612_v35  ;;  %v2615_v41 = vpop.f32.mrb[10].mxu1  ;;  %v3602_v52 = vadd.f32 %v2541_v50, %v2540_v48  ;;  %v2543_v53 = vpop.f32.mrb[10].mxu0 }
 0x108   :  { %v2616_v43 = vpop.f32.mrb[11].mxu1  ;;  %v2544_v56 = vpop.f32.mrb[11].mxu0 }
 0x109   :  { %v3596_v45 = vadd.f32 %v2616_v43, %v2615_v41  ;;  %v3606_v58 = vadd.f32 %v2544_v56, %v2543_v53 }
 0x10b   :  { %v556_v60 = vpack.c.bf16 %v3606_v58, %v3602_v52  ;;  %v4197_v52 = vpack.c.bf16 %v3596_v45, %v3592_v40 }
 0x10d   :  { %v2618_v49 = vpop.f32.mrb[12].mxu1  ;;  %v2546_v62 = vpop.f32.mrb[12].mxu0 }
 0x10e   :  { %v2619_v51 = vpop.f32.mrb[13].mxu1  ;;  %v2547_v0 = vpop.f32.mrb[13].mxu0 }
 0x10f   :  { %v3604_v54 = vadd.f32 %v2619_v51, %v2618_v49  ;;  %v2621_v55 = vpop.f32.mrb[14].mxu1  ;;  %v3614_v5 = vadd.f32 %v2547_v0, %v2546_v62  ;;  %v2549_v8 = vpop.f32.mrb[14].mxu0  ;;  %v1113_v49 = vsel %vm1111_vm1, %v3574_v22, 0 }
 0x110   :  { %v2622_v57 = vpop.f32.mrb[15].mxu1  ;;  %v2550_v13 = vpop.f32.mrb[15].mxu0 }
 0x111   :  { %v3608_v59 = vadd.f32 %v2622_v57, %v2621_v55  ;;  %v3616_v16 = vadd.f32 %v2550_v13, %v2549_v8 }
 0x113   :  { %v557_v20 = vpack.c.bf16 %v3616_v16, %v3614_v5  ;;  %v4198_v58 = vpack.c.bf16 %v3608_v59, %v3604_v54 }
 0x115   :  { %v2640_v63 = vpop.f32.mrb[16].mxu1  ;;  %v2552_v23 = vpop.f32.mrb[16].mxu0 }
 0x116   :  { %v2641_v1 = vpop.f32.mrb[17].mxu1  ;;  %v2553_v27 = vpop.f32.mrb[17].mxu0 }
 0x117   :  { %v2642_v9 = vadd.f32 %v2641_v1, %v2640_v63  ;;  %v2643_v12 = vpop.f32.mrb[18].mxu1  ;;  %v3621_v29 = vadd.f32 %v2553_v27, %v2552_v23  ;;  %v2555_v34 = vpop.f32.mrb[18].mxu0 }
 0x118   :  { %v2644_v15 = vpop.f32.mrb[19].mxu1  ;;  %v2556_v37 = vpop.f32.mrb[19].mxu0 }
 0x119   :  { %v2645_v19 = vadd.f32 %v2644_v15, %v2643_v12  ;;  %v3623_v41 = vadd.f32 %v2556_v37, %v2555_v34 }
 0x11b   :  { %v827_v21 = vpack.c.bf16 %v2645_v19, %v2642_v9  ;;  %v558_v43 = vpack.c.bf16 %v3623_v41, %v3621_v29 }
 0x11d   :  { %v2646_v25 = vpop.f32.mrb[20].mxu1  ;;  %2940 = vmatprep.mubr.msk.bf16.mxu0 %vm843_vm2, %v827_v21  ;;  %v2558_v50 = vpop.f32.mrb[20].mxu0 }
 0x11e   :  { %v2647_v28 = vpop.f32.mrb[21].mxu1  ;;  %v2559_v53 = vpop.f32.mrb[21].mxu0 }
 0x11f   :  { %v2648_v35 = vadd.f32 %v2647_v28, %v2646_v25  ;;  %v2649_v36 = vpop.f32.mrb[22].mxu1  ;;  %v3630_v56 = vadd.f32 %v2559_v53, %v2558_v50  ;;  %v2561_v57 = vpop.f32.mrb[22].mxu0 }
 0x120   :  { %v2650_v39 = vpop.f32.mrb[23].mxu1  ;;  %v2562_v0 = vpop.f32.mrb[23].mxu0 }
 0x121   :  { %v2651_v42 = vadd.f32 %v2650_v39, %v2649_v36  ;;  %v3632_v8 = vadd.f32 %v2562_v0, %v2561_v57 }
 0x123   :  { %v828_v48 = vpack.c.bf16 %v2651_v42, %v2648_v35  ;;  %v559_v22 = vpack.c.bf16 %v3632_v8, %v3630_v56 }
 0x125   :  { %v2652_v51 = vpop.f32.mrb[24].mxu1  ;;  %2941 = vmatmul.mubr.msk.bf16.vlgmr.msra.gmra.mrb[48].mxu0 %vm843_vm2, %v828_v48  ;;  %v2564_v13 = vpop.f32.mrb[24].mxu0 }
 0x126   :  { %v2653_v55 = vpop.f32.mrb[25].mxu1  ;;  %2973 = vmatpush3.bf16.msra.mxu0 %v1113_v49  ;;  %v2565_v19 = vpop.f32.mrb[25].mxu0 }
 0x127   :  { %v2654_v62 = vadd.f32 %v2653_v55, %v2652_v51  ;;  %v2655_v63 = vpop.f32.mrb[26].mxu1  ;;  %v3637_v23 = vadd.f32 %v2565_v19, %v2564_v13  ;;  %v2567_v25 = vpop.f32.mrb[26].mxu0 }
 0x128   :  { %v2656_v1 = vpop.f32.mrb[27].mxu1  ;;  %v2568_v34 = vpop.f32.mrb[27].mxu0 }
 0x129   :  { %v2657_v9 = vadd.f32 %v2656_v1, %v2655_v63  ;;  %v3639_v36 = vadd.f32 %v2568_v34, %v2567_v25 }
 0x12b   :  { %v829_v12 = vpack.c.bf16 %v2657_v9, %v2654_v62  ;;  %v560_v39 = vpack.c.bf16 %v3639_v36, %v3637_v23 }
 0x12d   :  { %v2658_v15 = vpop.f32.mrb[28].mxu1  ;;  %2944 = vmatprep.mubr.msk.bf16.mxu0 %vm843_vm2, %v829_v12  ;;  %v2570_v48 = vpop.f32.mrb[28].mxu0 }
 0x12e   :  { %v2659_v21 = vpop.f32.mrb[29].mxu1  ;;  %v2571_v50 = vpop.f32.mrb[29].mxu0 }
 0x12f   :  { %v2660_v27 = vadd.f32 %v2659_v21, %v2658_v15  ;;  %v2661_v28 = vpop.f32.mrb[30].mxu1  ;;  %v3644_v53 = vadd.f32 %v2571_v50, %v2570_v48  ;;  %v2573_v55 = vpop.f32.mrb[30].mxu0 }
 0x130   :  { %v2662_v35 = vpop.f32.mrb[31].mxu1  ;;  %v2574_v63 = vpop.f32.mrb[31].mxu0 }
 0x131   :  { %v2663_v37 = vadd.f32 %v2662_v35, %v2661_v28  ;;  %v3646_v1 = vadd.f32 %v2574_v63, %v2573_v55 }
 0x133   :  { %v830_v42 = vpack.c.bf16 %v2663_v37, %v2660_v27  ;;  %v561_v12 = vpack.c.bf16 %v3646_v1, %v3644_v53 }
 0x135   :  { %v2664_v49 = vpop.f32.mrb[32].mxu1  ;;  %2945 = vmatmul.mubr.msk.bf16.gmra.mrb[52].mxu0 %vm843_vm2, %v830_v42  ;;  %v2576_v15 = vpop.f32.mrb[32].mxu0 }
 0x136   :  { %v2665_v51 = vpop.f32.mrb[33].mxu1  ;;  %v2577_v21 = vpop.f32.mrb[33].mxu0 }
 0x137   :  { %v2666_v57 = vadd.f32 %v2665_v51, %v2664_v49  ;;  %v2667_v62 = vpop.f32.mrb[34].mxu1  ;;  %v3651_v27 = vadd.f32 %v2577_v21, %v2576_v15  ;;  %v2579_v28 = vpop.f32.mrb[34].mxu0 }
 0x138   :  { %v2668_v0 = vpop.f32.mrb[35].mxu1  ;;  %v2580_v37 = vpop.f32.mrb[35].mxu0 }
 0x139   :  { %v2669_v9 = vadd.f32 %v2668_v0, %v2667_v62  ;;  %v3653_v48 = vadd.f32 %v2580_v37, %v2579_v28 }
 0x13b   :  { %v831_v13 = vpack.c.bf16 %v2669_v9, %v2666_v57  ;;  %v4191_v24 = vpack.c.bf16 %v3653_v48, %v3651_v27 }
 0x13d   :  { %v2670_v19 = vpop.f32.mrb[36].mxu1  ;;  %2948 = vmatprep.mubr.msk.bf16.mxu0 %vm843_vm2, %v831_v13  ;;  %v2582_v55 = vpop.f32.mrb[36].mxu0 }
 0x13e   :  { %v2671_v25 = vpop.f32.mrb[37].mxu1  ;;  %v2583_v62 = vpop.f32.mrb[37].mxu0 }
 0x13f   :  { %v2672_v34 = vadd.f32 %v2671_v25, %v2670_v19  ;;  %v2673_v35 = vpop.f32.mrb[38].mxu1  ;;  %v3658_v0 = vadd.f32 %v2583_v62, %v2582_v55  ;;  %v2585_v9 = vpop.f32.mrb[38].mxu0 }
 0x140   :  { %v2674_v42 = vpop.f32.mrb[39].mxu1  ;;  %v2586_v19 = vpop.f32.mrb[39].mxu0 }
 0x141   :  { %v2675_v49 = vadd.f32 %v2674_v42, %v2673_v35  ;;  %v3660_v25 = vadd.f32 %v2586_v19, %v2585_v9 }
 0x143   :  { %v832_v51 = vpack.c.bf16 %v2675_v49, %v2672_v34  ;;  %v4192_v30 = vpack.c.bf16 %v3660_v25, %v3658_v0 }
 0x145   :  { %v2676_v57 = vpop.f32.mrb[40].mxu1  ;;  %2949 = vmatmul.mubr.msk.bf16.gmra.mrb[56].mxu0 %vm843_vm2, %v832_v51  ;;  %v2588_v37 = vpop.f32.mrb[40].mxu0 }
 0x146   :  { %v2677_v63 = vpop.f32.mrb[41].mxu1  ;;  %v2589_v49 = vpop.f32.mrb[41].mxu0 }
 0x147   :  { %v2678_v13 = vadd.f32 %v2677_v63, %v2676_v57  ;;  %v2679_v15 = vpop.f32.mrb[42].mxu1  ;;  %v3665_v55 = vadd.f32 %v2589_v49, %v2588_v37  ;;  %v2591_v62 = vpop.f32.mrb[42].mxu0  ;;  %v3249_v37 = vld [vmem:[%s4187_s3 + $0x10] sm:$0xff]  }
 0x148   :  { %v2680_v21 = vpop.f32.mrb[43].mxu1  ;;  %v2592_v7 = vpop.f32.mrb[43].mxu0  ;;  %3006 = vmatprep.subr.bf16.mxu1 %v3249_v37 }
 0x149   :  { %v2681_v28 = vadd.f32 %v2680_v21, %v2679_v15  ;;  %v3667_v9 = vadd.f32 %v2592_v7, %v2591_v62  ;;  %3007 = vmatpush3.bf16.msra.mxu1 %v3249_v37 }
 0x14b   :  { %v833_v34 = vpack.c.bf16 %v2681_v28, %v2678_v13 }
 0x14d   :  { %v2682_v42 = vpop.f32.mrb[44].mxu1  ;;  %2952 = vmatprep.mubr.msk.bf16.mxu0 %vm843_vm2, %v833_v34  ;;  %v2594_v21 = vpop.f32.mrb[44].mxu0 }
 0x14e   :  { %v2683_v51 = vpop.f32.mrb[45].mxu1  ;;  %v2595_v34 = vpop.f32.mrb[45].mxu0 }
 0x14f   :  { %v2684_v57 = vadd.f32 %v2683_v51, %v2682_v42  ;;  %v2685_v63 = vpop.f32.mrb[46].mxu1  ;;  %v3250_v42 = vld [vmem:[%s4187_s3 + $0x18] sm:$0xff]   ;;  %v3678_v49 = vadd.f32 %v2595_v34, %v2594_v21 }
 0x150   :  { %v2686_v6 = vpop.f32.mrb[47].mxu1  ;;  %3008 = vmatprep.subr.bf16.mxu1 %v3250_v42 }
 0x151   :  { %v2687_v15 = vadd.f32 %v2686_v6, %v2685_v63  ;;  %v2597_v6 = vpop.f32.mrb[46].mxu0  ;;  %3009 = vmatpush3.bf16.msra.mxu1 %v3250_v42 }
 0x153   :  { %v834_v13 = vpack.c.bf16 %v2687_v15, %v2684_v57  ;;  %v2598_v57 = vpop.f32.mrb[47].mxu0 }
 0x154   :  { %v3680_v15 = vadd.f32 %v2598_v57, %v2597_v6 }
 0x155   :  { %v2688_v28 = vpop.f32.mrb[48].mxu1  ;;  %2953 = vmatmul.mubr.msk.bf16.gmra.mrb[60].mxu0 %vm843_vm2, %v834_v13 }
 0x156   :  { %v2689_v7 = vpop.f32.mrb[49].mxu1  ;;  %v4194_v38 = vpack.c.bf16 %v3680_v15, %v3678_v49 }
 0x157   :  { %v2690_v51 = vadd.f32 %v2689_v7, %v2688_v28  ;;  %v2691_v62 = vpop.f32.mrb[50].mxu1 }
 0x158   :  { %v2692_v63 = vpop.f32.mrb[51].mxu1 }
 0x159   :  { %v2693_v13 = vadd.f32 %v2692_v63, %v2691_v62 }
 0x15b   :  { %v835_v47 = vpack.c.bf16 %v2693_v13, %v2690_v51 }
 0x15d   :  { %v2694_v33 = vpop.f32.mrb[52].mxu1  ;;  %2956 = vmatprep.mubr.msk.bf16.mxu0 %vm843_vm2, %v835_v47 }
 0x15e   :  { %v2695_v21 = vpop.f32.mrb[53].mxu1 }
 0x15f   :  { %v2696_v34 = vadd.f32 %v2695_v21, %v2694_v33  ;;  %v2697_v28 = vpop.f32.mrb[54].mxu1 }
 0x160   :  { %v2698_v7 = vpop.f32.mrb[55].mxu1 }
 0x161   :  { %v2699_v18 = vadd.f32 %v2698_v7, %v2697_v28 }
 0x163   :  { %v836_v19 = vpack.c.bf16 %v2699_v18, %v2696_v34 }
 0x165   :  { %v2700_v35 = vpop.f32.mrb[56].mxu1  ;;  %2957 = vmatmul.mubr.msk.bf16.gmra.mrb[64].mxu0 %vm843_vm2, %v836_v19 }
 0x166   :  { %v2701_v37 = vpop.f32.mrb[57].mxu1 }
 0x167   :  { %v2702_v6 = vadd.f32 %v2701_v37, %v2700_v35  ;;  %v2703_v62 = vpop.f32.mrb[58].mxu1 }
 0x168   :  { %v2704_v57 = vpop.f32.mrb[59].mxu1 }
 0x169   :  { %v2705_v63 = vadd.f32 %v2704_v57, %v2703_v62 }
 0x16b   :  { %v837_v61 = vpack.c.bf16 %v2705_v63, %v2702_v6 }
 0x16d   :  { %v2706_v51 = vpop.f32.mrb[60].mxu1  ;;  %2960 = vmatprep.mubr.msk.bf16.mxu0 %vm843_vm2, %v837_v61 }
 0x16e   :  { %v2707_v42 = vpop.f32.mrb[61].mxu1 }
 0x16f   :  { %v2708_v47 = vadd.f32 %v2707_v42, %v2706_v51  ;;  %v2709_v13 = vpop.f32.mrb[62].mxu1 }
 0x170   :  { %v2710_v33 = vpop.f32.mrb[63].mxu1 }
 0x171   :  { %v2711_v21 = vadd.f32 %v2710_v33, %v2709_v13 }
 0x173   :  { %v838_v50 = vpack.c.bf16 %v2711_v21, %v2708_v47 }
 0x175   :  { %v2712_v28 = vpop.f32.mrb[64].mxu1  ;;  %2961 = vmatmul.mubr.msk.bf16.gmra.mrb[68].mxu0 %vm843_vm2, %v838_v50 }
 0x176   :  { %v2713_v18 = vpop.f32.mrb[65].mxu1 }
 0x177   :  { %v2714_v19 = vadd.f32 %v2713_v18, %v2712_v28  ;;  %v2715_v34 = vpop.f32.mrb[66].mxu1 }
 0x178   :  { %v2716_v35 = vpop.f32.mrb[67].mxu1 }
 0x179   :  { %v2717_v7 = vadd.f32 %v2716_v35, %v2715_v34 }
 0x17b   :  { %v839_v37 = vpack.c.bf16 %v2717_v7, %v2714_v19 }
 0x17d   :  { %v2718_v62 = vpop.f32.mrb[68].mxu1  ;;  %2964 = vmatprep.mubr.msk.bf16.mxu0 %vm843_vm2, %v839_v37 }
 0x17e   :  { %v2719_v6 = vpop.f32.mrb[69].mxu1 }
 0x17f   :  { %v2720_v61 = vadd.f32 %v2719_v6, %v2718_v62  ;;  %v2721_v57 = vpop.f32.mrb[70].mxu1 }
 0x180   :  { %v2722_v63 = vpop.f32.mrb[71].mxu1 }
 0x181   :  { %v2723_v51 = vadd.f32 %v2722_v63, %v2721_v57 }
 0x183   :  { %v840_v42 = vpack.c.bf16 %v2723_v51, %v2720_v61 }
 0x185   :  { %v2724_v13 = vpop.f32.mrb[72].mxu1  ;;  %2965 = vmatmul.mubr.msk.bf16.gmra.mrb[72].mxu0 %vm843_vm2, %v840_v42 }
 0x186   :  { %v2725_v47 = vpop.f32.mrb[73].mxu1 }
 0x187   :  { %v2726_v50 = vadd.f32 %v2725_v47, %v2724_v13  ;;  %v2727_v33 = vpop.f32.mrb[74].mxu1 }
 0x188   :  { %v2728_v21 = vpop.f32.mrb[75].mxu1 }
 0x189   :  { %v2729_v28 = vadd.f32 %v2728_v21, %v2727_v33 }
 0x18b   :  { %v841_v18 = vpack.c.bf16 %v2729_v28, %v2726_v50 }
 0x18d   :  { %v2730_v34 = vpop.f32.mrb[76].mxu1  ;;  %2968 = vmatprep.mubr.msk.bf16.mxu0 %vm843_vm2, %v841_v18 }
 0x18e   :  { %v2731_v19 = vpop.f32.mrb[77].mxu1 }
 0x18f   :  { %v2732_v35 = vadd.f32 %v2731_v19, %v2730_v34  ;;  %v2733_v7 = vpop.f32.mrb[78].mxu1 }
 0x190   :  { %v2734_v37 = vpop.f32.mrb[79].mxu1 }
 0x191   :  { %v2735_v62 = vadd.f32 %v2734_v37, %v2733_v7 }
 0x193   :  { %v842_v6 = vpack.c.bf16 %v2735_v62, %v2732_v35 }
 0x195   :  { %2969 = vmatmul.mubr.msk.bf16.gmra.mrb[76].mxu0 %vm843_vm2, %v842_v6 }
 0x196   :  { %2974 = vmatprep.mubr.msk.bf16.mxu0 %vm1062_vm3, %v554_v32  ;;  %v4193_v32 = vpack.c.bf16 %v3667_v9, %v3665_v55 }
 0x19d   :  { %2975 = vmatmul.mubr.msk.bf16.vlgmr.msra.gmra.mrb[48].mxu0 %vm1062_vm3, %v555_v46  ;;  %v4196_v46 = vpack.c.bf16 %v3584_v31, %v3578_v26 }
 0x19e   :  { %2978 = vmatprep.mubr.msk.bf16.mxu0 %vm1062_vm3, %v556_v60  ;;  %v1278_v60 = vsub.s32 0, %v3544_v4 }
 0x1a0   :  { %v3759_v17 = vrot.slane %v4199_v14, %v1278_v60 }
 0x1a5   :  { %2979 = vmatmul.mubr.msk.bf16.gmra.mrb[52].mxu0 %vm1062_vm3, %v557_v20 }
 0x1a6   :  { %2982 = vmatprep.mubr.msk.bf16.mxu0 %vm1062_vm3, %v558_v43 }
 0x1ad   :  { %2983 = vmatmul.mubr.msk.bf16.gmra.mrb[56].mxu0 %vm1062_vm3, %v559_v22 }
 0x1ae   :  { %2986 = vmatprep.mubr.msk.bf16.mxu0 %vm1062_vm3, %v560_v39 }
 0x1b5   :  { %2987 = vmatmul.mubr.msk.bf16.gmra.mrb[60].mxu0 %vm1062_vm3, %v561_v12 }
 0x1b6   :  { %2990 = vmatprep.mubr.msk.bf16.mxu0 %vm1062_vm3, %v4191_v24 }
 0x1bd   :  { %2991 = vmatmul.mubr.msk.bf16.gmra.mrb[64].mxu0 %vm1062_vm3, %v4192_v30 }
 0x1be   :  { %2994 = vmatprep.mubr.msk.bf16.mxu0 %vm1062_vm3, %v4193_v32 }
 0x1c5   :  { %2995 = vmatmul.mubr.msk.bf16.gmra.mrb[68].mxu0 %vm1062_vm3, %v4194_v38 }
 0x1c6   :  { %2998 = vmatprep.mubr.msk.bf16.mxu0 %vm1062_vm3, %v4195_v44 }
 0x1cd   :  { %2999 = vmatmul.mubr.msk.bf16.gmra.mrb[72].mxu0 %vm1062_vm3, %v4196_v46 }
 0x1ce   :  { %3002 = vmatprep.mubr.msk.bf16.mxu0 %vm1062_vm3, %v4197_v52 }
 0x1d5   :  { %3003 = vmatmul.mubr.msk.bf16.gmra.mrb[76].mxu0 %vm1062_vm3, %v4198_v58 }
 0x270   :  { %v2976_v5 = vpop.f32.mrb[48].mxu0 }
 0x271   :  { %v1282_v26 = vadd.f32 %v2976_v5, %v3759_v17  ;;  %v1149_v31 = vpop.f32.mrb[49].mxu0 }
 0x272   :  { %v1280_v16 = vadd.f32 %v3759_v17, %v1149_v31  ;;  %v2977_v40 = vpop.f32.mrb[50].mxu0 }
 0x273   :  { %v1283_v45 = vadd.f32 %v2977_v40, %v3759_v17  ;;  %v1152_v20 = vpop.f32.mrb[51].mxu0  ;;  %v1314_v59 = vmax.f32 %v1282_v26, 0.0 }
 0x274   :  { %v1281_v54 = vadd.f32 %v3759_v17, %v1152_v20  ;;  %v1312_v41 = vmax.f32 %v1280_v16, 0.0 }
 0x275   :  { %v1315_v29 = vmax.f32 %v1283_v45, 0.0 }
 0x276   :  { %v1313_v43 = vmax.f32 %v1281_v54, 0.0 }
 0x277   :  { %v1345_v56 = vpack.c.bf16 %v1315_v29, %v1314_v59 }
 0x278   :  { %v1344_v2 = vpack.c.bf16 %v1313_v43, %v1312_v41  ;;  %v2980_v8 = vpop.f32.mrb[52].mxu0 }
 0x279   :  { %v1286_v22 = vadd.f32 %v2980_v8, %v3759_v17  ;;  %v1165_v23 = vpop.f32.mrb[53].mxu0 }
 0x27a   :  { %v1284_v36 = vadd.f32 %v3759_v17, %v1165_v23  ;;  %v2981_v39 = vpop.f32.mrb[54].mxu0  ;;  %3010 = vmatprep.mubr.msk.bf16.mxu1 %vm1372_vm4, %v1344_v2 }
 0x27b   :  { %v1287_v53 = vadd.f32 %v2981_v39, %v3759_v17  ;;  %v1168_v1 = vpop.f32.mrb[55].mxu0  ;;  %3011 = vmatmul.mubr.msk.bf16.vlgmr.msra.gmra.mrb[80].mxu1 %vm1372_vm4, %v1345_v56  ;;  %v1318_v27 = vmax.f32 %v1286_v22, 0.0 }
 0x27c   :  { %v1285_v12 = vadd.f32 %v3759_v17, %v1168_v1  ;;  %v1316_v0 = vmax.f32 %v1284_v36, 0.0 }
 0x27d   :  { %v1319_v48 = vmax.f32 %v1287_v53, 0.0 }
 0x27e   :  { %v1317_v25 = vmax.f32 %v1285_v12, 0.0 }
 0x27f   :  { %v1347_v55 = vpack.c.bf16 %v1319_v48, %v1318_v27 }
 0x280   :  { %v1346_v9 = vpack.c.bf16 %v1317_v25, %v1316_v0  ;;  %v2984_v49 = vpop.f32.mrb[56].mxu0 }
 0x281   :  { %v1290_v15 = vadd.f32 %v2984_v49, %v3759_v17  ;;  %v1181_v61 = vpop.f32.mrb[57].mxu0 }
 0x282   :  { %v1288_v57 = vadd.f32 %v3759_v17, %v1181_v61  ;;  %v2985_v63 = vpop.f32.mrb[58].mxu0  ;;  %3014 = vmatprep.mubr.msk.bf16.mxu1 %vm1372_vm4, %v1346_v9 }
 0x283   :  { %v1291_v51 = vadd.f32 %v2985_v63, %v3759_v17  ;;  %v1184_v42 = vpop.f32.mrb[59].mxu0  ;;  %3015 = vmatmul.mubr.msk.bf16.gmra.mrb[84].mxu1 %vm1372_vm4, %v1347_v55  ;;  %v1322_v47 = vmax.f32 %v1290_v15, 0.0 }
 0x284   :  { %v1289_v13 = vadd.f32 %v3759_v17, %v1184_v42  ;;  %v1320_v33 = vmax.f32 %v1288_v57, 0.0 }
 0x285   :  { %v1323_v50 = vmax.f32 %v1291_v51, 0.0 }
 0x286   :  { %v1321_v21 = vmax.f32 %v1289_v13, 0.0 }
 0x287   :  { %v1349_v28 = vpack.c.bf16 %v1323_v50, %v1322_v47 }
 0x288   :  { %v1348_v18 = vpack.c.bf16 %v1321_v21, %v1320_v33  ;;  %v2988_v34 = vpop.f32.mrb[60].mxu0 }
 0x289   :  { %v1294_v19 = vadd.f32 %v2988_v34, %v3759_v17  ;;  %v1197_v35 = vpop.f32.mrb[61].mxu0 }
 0x28a   :  { %v1292_v7 = vadd.f32 %v3759_v17, %v1197_v35  ;;  %v2989_v37 = vpop.f32.mrb[62].mxu0  ;;  %3018 = vmatprep.mubr.msk.bf16.mxu1 %vm1372_vm4, %v1348_v18 }
 0x28b   :  { %v1295_v62 = vadd.f32 %v2989_v37, %v3759_v17  ;;  %v1200_v6 = vpop.f32.mrb[63].mxu0  ;;  %3019 = vmatmul.mubr.msk.bf16.gmra.mrb[88].mxu1 %vm1372_vm4, %v1349_v28  ;;  %v1326_v30 = vmax.f32 %v1294_v19, 0.0 }
 0x28c   :  { %v1293_v24 = vadd.f32 %v3759_v17, %v1200_v6  ;;  %v1324_v38 = vmax.f32 %v1292_v7, 0.0 }
 0x28d   :  { %v1327_v32 = vmax.f32 %v1295_v62, 0.0 }
 0x28e   :  { %v1325_v44 = vmax.f32 %v1293_v24, 0.0 }
 0x28f   :  { %v1351_v46 = vpack.c.bf16 %v1327_v32, %v1326_v30 }
 0x290   :  { %v1350_v52 = vpack.c.bf16 %v1325_v44, %v1324_v38  ;;  %v2992_v58 = vpop.f32.mrb[64].mxu0  ;;  %v3257_v44 = vld [vmem:[%s4185_s2 + $0x4] ss:$8 sps:$4 sm:$0xff]  }
 0x291   :  { %v1298_v60 = vadd.f32 %v2992_v58, %v3759_v17  ;;  %v1213_v14 = vpop.f32.mrb[65].mxu0 }
 0x292   :  { %v1296_v5 = vadd.f32 %v3759_v17, %v1213_v14  ;;  %v2993_v26 = vpop.f32.mrb[66].mxu0  ;;  %3022 = vmatprep.mubr.msk.bf16.mxu1 %vm1372_vm4, %v1350_v52 }
 0x293   :  { %v1299_v31 = vadd.f32 %v2993_v26, %v3759_v17  ;;  %v1216_v16 = vpop.f32.mrb[67].mxu0  ;;  %3023 = vmatmul.mubr.msk.bf16.gmra.mrb[92].mxu1 %vm1372_vm4, %v1351_v46  ;;  %v1330_v45 = vmax.f32 %v1298_v60, 0.0 }
 0x294   :  { %v1297_v40 = vadd.f32 %v3759_v17, %v1216_v16  ;;  %v1328_v54 = vmax.f32 %v1296_v5, 0.0 }
 0x295   :  { %v1331_v20 = vmax.f32 %v1299_v31, 0.0 }
 0x296   :  { %v1329_v59 = vmax.f32 %v1297_v40, 0.0 }
 0x297   :  { %v1353_v29 = vpack.c.bf16 %v1331_v20, %v1330_v45 }
 0x298   :  { %v1352_v41 = vpack.c.bf16 %v1329_v59, %v1328_v54  ;;  %v2996_v43 = vpop.f32.mrb[68].mxu0 }
 0x299   :  { %v1302_v56 = vadd.f32 %v2996_v43, %v3759_v17  ;;  %v1229_v2 = vpop.f32.mrb[69].mxu0 }
 0x29a   :  { %v1300_v8 = vadd.f32 %v3759_v17, %v1229_v2  ;;  %v2997_v22 = vpop.f32.mrb[70].mxu0  ;;  %3026 = vmatprep.mubr.msk.bf16.mxu1 %vm1372_vm4, %v1352_v41 }
 0x29b   :  { %v1303_v23 = vadd.f32 %v2997_v22, %v3759_v17  ;;  %v1232_v36 = vpop.f32.mrb[71].mxu0  ;;  %3027 = vmatmul.mubr.msk.bf16.gmra.mrb[96].mxu1 %vm1372_vm4, %v1353_v29  ;;  %v1334_v53 = vmax.f32 %v1302_v56, 0.0 }
 0x29c   :  { %v1301_v39 = vadd.f32 %v3759_v17, %v1232_v36  ;;  %v1332_v12 = vmax.f32 %v1300_v8, 0.0 }
 0x29d   :  { %v1335_v1 = vmax.f32 %v1303_v23, 0.0 }
 0x29e   :  { %v1333_v27 = vmax.f32 %v1301_v39, 0.0 }
 0x29f   :  { %v1355_v48 = vpack.c.bf16 %v1335_v1, %v1334_v53 }
 0x2a0   :  { %v1354_v0 = vpack.c.bf16 %v1333_v27, %v1332_v12  ;;  %v3000_v25 = vpop.f32.mrb[72].mxu0 }
 0x2a1   :  { %v1306_v55 = vadd.f32 %v3000_v25, %v3759_v17  ;;  %v1245_v9 = vpop.f32.mrb[73].mxu0 }
 0x2a2   :  { %v1304_v49 = vadd.f32 %v3759_v17, %v1245_v9  ;;  %v3001_v15 = vpop.f32.mrb[74].mxu0  ;;  %3030 = vmatprep.mubr.msk.bf16.mxu1 %vm1372_vm4, %v1354_v0 }
 0x2a3   :  { %v1307_v61 = vadd.f32 %v3001_v15, %v3759_v17  ;;  %v1248_v57 = vpop.f32.mrb[75].mxu0  ;;  %3031 = vmatmul.mubr.msk.bf16.gmra.mrb[100].mxu1 %vm1372_vm4, %v1355_v48  ;;  %v1338_v51 = vmax.f32 %v1306_v55, 0.0 }
 0x2a4   :  { %v1305_v63 = vadd.f32 %v3759_v17, %v1248_v57  ;;  %v1336_v13 = vmax.f32 %v1304_v49, 0.0 }
 0x2a5   :  { %v1339_v42 = vmax.f32 %v1307_v61, 0.0 }
 0x2a6   :  { %v1337_v47 = vmax.f32 %v1305_v63, 0.0 }
 0x2a7   :  { %v1357_v50 = vpack.c.bf16 %v1339_v42, %v1338_v51 }
 0x2a8   :  { %v1356_v33 = vpack.c.bf16 %v1337_v47, %v1336_v13  ;;  %v3004_v21 = vpop.f32.mrb[76].mxu0 }
 0x2a9   :  { %v1310_v28 = vadd.f32 %v3004_v21, %v3759_v17  ;;  %v1261_v18 = vpop.f32.mrb[77].mxu0 }
 0x2aa   :  { %v1308_v34 = vadd.f32 %v3759_v17, %v1261_v18  ;;  %v3005_v19 = vpop.f32.mrb[78].mxu0  ;;  %3034 = vmatprep.mubr.msk.bf16.mxu1 %vm1372_vm4, %v1356_v33 }
 0x2ab   :  { %v1311_v35 = vadd.f32 %v3005_v19, %v3759_v17  ;;  %v1264_v7 = vpop.f32.mrb[79].mxu0  ;;  %3035 = vmatmul.mubr.msk.bf16.gmra.mrb[104].mxu1 %vm1372_vm4, %v1357_v50  ;;  %v1342_v62 = vmax.f32 %v1310_v28, 0.0  ;;  %v3259_v19 = vld [vmem:[%s4185_s2 + $0x14] ss:$8 sps:$4 sm:$0xff]  }
 0x2ac   :  { %v1309_v37 = vadd.f32 %v3759_v17, %v1264_v7  ;;  %v1340_v24 = vmax.f32 %v1308_v34, 0.0  ;;  %v3258_v34 = vld [vmem:[%s4185_s2] ss:$8 sps:$4 sm:$0xff]   ;;  %v3261_v7 = vld [vmem:[%s4185_s2 + $0x24] ss:$8 sps:$4 sm:$0xff]  }
 0x2ad   :  { %v1343_v6 = vmax.f32 %v1311_v35, 0.0  ;;  %v3260_v35 = vld [vmem:[%s4185_s2 + $0x10] ss:$8 sps:$4 sm:$0xff]  }
 0x2ae   :  { %v1341_v30 = vmax.f32 %v1309_v37, 0.0  ;;  %v3262_v37 = vld [vmem:[%s4185_s2 + $0x20] ss:$8 sps:$4 sm:$0xff]  }
 0x2af   :  { %v1359_v32 = vpack.c.bf16 %v1343_v6, %v1342_v62  ;;  %v3263_v62 = vld [vmem:[%s4185_s2 + $0x34] ss:$8 sps:$4 sm:$0xff]   ;;  %v3264_v6 = vld [vmem:[%s4185_s2 + $0x30] ss:$8 sps:$4 sm:$0xff]  }
 0x2b0   :  { %v1358_v38 = vpack.c.bf16 %v1341_v30, %v1340_v24  ;;  %v3265_v24 = vld [vmem:[%s4185_s2 + $0x44] ss:$8 sps:$4 sm:$0xff]   ;;  %v3266_v30 = vld [vmem:[%s4185_s2 + $0x40] ss:$8 sps:$4 sm:$0xff]  }
 0x2b2   :  { %3038 = vmatprep.mubr.msk.bf16.mxu1 %vm1372_vm4, %v1358_v38  ;;  %v3268_v38 = vld [vmem:[%s4185_s2 + $0x50] ss:$8 sps:$4 sm:$0xff]  }
 0x2b3   :  { %3039 = vmatmul.mubr.msk.bf16.gmra.mrb[108].mxu1 %vm1372_vm4, %v1359_v32  ;;  %v3267_v32 = vld [vmem:[%s4185_s2 + $0x54] ss:$8 sps:$4 sm:$0xff]  }
 0x2b4   :  { %1634 = vmatprep.mubr.bf16.mxu1 %v3257_v44  ;;  %v3269_v44 = vld [vmem:[%s4185_s2 + $0x64] ss:$8 sps:$4 sm:$0xff]  }
 0x34e   :  { %v3012_v46 = vpop.f32.mrb[80].mxu1 }
 0x34f   :  { %v1455_v52 = vpop.f32.mrb[81].mxu1 }
 0x350   :  { %v3013_v58 = vpop.f32.mrb[82].mxu1 }
 0x351   :  { %v1583_v60 = vpack.c.bf16 %v3013_v58, %v3012_v46  ;;  %v1458_v17 = vpop.f32.mrb[83].mxu1  ;;  %v3270_v46 = vld [vmem:[%s4185_s2 + $0x60] ss:$8 sps:$4 sm:$0xff]   ;;  %v3272_v58 = vld [vmem:[%s4185_s2 + $0x70] ss:$8 sps:$4 sm:$0xff]  }
 0x352   :  { %v1582_v14 = vpack.c.bf16 %v1458_v17, %v1455_v52  ;;  %v3271_v52 = vld [vmem:[%s4185_s2 + $0x74] ss:$8 sps:$4 sm:$0xff]   ;;  %v3274_v17 = vld [vmem:[%s4185_s2 + $0x80] ss:$8 sps:$4 sm:$0xff]  }
 0x356   :  { %v3016_v5 = vpop.f32.mrb[84].mxu1 }
 0x357   :  { %v1471_v26 = vpop.f32.mrb[85].mxu1 }
 0x358   :  { %v3017_v31 = vpop.f32.mrb[86].mxu1 }
 0x359   :  { %v1585_v16 = vpack.c.bf16 %v3017_v31, %v3016_v5  ;;  %v1474_v40 = vpop.f32.mrb[87].mxu1  ;;  %v3276_v5 = vld [vmem:[%s4185_s2 + $0x90] ss:$8 sps:$4 sm:$0xff]   ;;  %v3278_v31 = vld [vmem:[%s4185_s2 + $0xa0] ss:$8 sps:$4 sm:$0xff]  }
 0x35a   :  { %v1584_v45 = vpack.c.bf16 %v1474_v40, %v1471_v26  ;;  %v3277_v26 = vld [vmem:[%s4185_s2 + $0xa4] ss:$8 sps:$4 sm:$0xff]   ;;  %v3280_v40 = vld [vmem:[%s4185_s2 + $0xb0] ss:$8 sps:$4 sm:$0xff]  }
 0x35e   :  { %v3020_v20 = vpop.f32.mrb[88].mxu1 }
 0x35f   :  { %v1487_v54 = vpop.f32.mrb[89].mxu1 }
 0x360   :  { %v3021_v59 = vpop.f32.mrb[90].mxu1 }
 0x361   :  { %v1587_v29 = vpack.c.bf16 %v3021_v59, %v3020_v20  ;;  %v1490_v41 = vpop.f32.mrb[91].mxu1  ;;  %v3251_v20 = vld [vmem:[%s4187_s3 + $0x20] sm:$0xff]   ;;  %v3283_v59 = vld [vmem:[%s4185_s2 + $0xd4] ss:$8 sps:$4 sm:$0xff]  }
 0x362   :  { %v1586_v43 = vpack.c.bf16 %v1490_v41, %v1487_v54  ;;  %3042 = vmatprep.subr.bf16.mxu0 %v3251_v20  ;;  %v3282_v54 = vld [vmem:[%s4185_s2 + $0xc0] ss:$8 sps:$4 sm:$0xff]   ;;  %v3284_v41 = vld [vmem:[%s4185_s2 + $0xd0] ss:$8 sps:$4 sm:$0xff]  }
 0x363   :  { %3043 = vmatpush3.bf16.msra.mxu0 %v3251_v20 }
 0x366   :  { %v3024_v56 = vpop.f32.mrb[92].mxu1 }
 0x367   :  { %v1503_v2 = vpop.f32.mrb[93].mxu1 }
 0x368   :  { %v3025_v8 = vpop.f32.mrb[94].mxu1 }
 0x369   :  { %v1589_v22 = vpack.c.bf16 %v3025_v8, %v3024_v56  ;;  %v1506_v23 = vpop.f32.mrb[95].mxu1  ;;  %v3286_v56 = vld [vmem:[%s4185_s2 + $0xe0] ss:$8 sps:$4 sm:$0xff]   ;;  %v3288_v8 = vld [vmem:[%s4185_s2 + $0xf0] ss:$8 sps:$4 sm:$0xff]  }
 0x36a   :  { %v1588_v36 = vpack.c.bf16 %v1506_v23, %v1503_v2  ;;  %v3287_v2 = vld [vmem:[%s4185_s2 + $0xf4] ss:$8 sps:$4 sm:$0xff]  }
 0x36e   :  { %v3028_v39 = vpop.f32.mrb[96].mxu1 }
 0x36f   :  { %v1519_v53 = vpop.f32.mrb[97].mxu1 }
 0x370   :  { %v3029_v1 = vpop.f32.mrb[98].mxu1 }
 0x371   :  { %v1591_v12 = vpack.c.bf16 %v3029_v1, %v3028_v39  ;;  %v1522_v27 = vpop.f32.mrb[99].mxu1 }
 0x372   :  { %v1590_v48 = vpack.c.bf16 %v1522_v27, %v1519_v53  ;;  %v3253_v27 = vld [vmem:[%s4187_s3 + $0x30] sm:$0xff]  }
 0x374   :  { %2788 = vmatprep.subr.bf16.mxu1 %v1590_v48 }
 0x375   :  { %2789 = vmatpush3.bf16.msra.mxu1 %v1582_v14  ;;  %v3275_v14 = vld [vmem:[%s4185_s2 + $0x94] ss:$8 sps:$4 sm:$0xff]  }
 0x376   :  { %v3032_v0 = vpop.f32.mrb[100].mxu1  ;;  %2790 = vmatprep.subr.bf16.mxu1 %v1591_v12 }
 0x377   :  { %v1535_v25 = vpop.f32.mrb[101].mxu1 }
 0x378   :  { %v3033_v55 = vpop.f32.mrb[102].mxu1 }
 0x379   :  { %v1593_v9 = vpack.c.bf16 %v3033_v55, %v3032_v0  ;;  %v1538_v49 = vpop.f32.mrb[103].mxu1  ;;  %2791 = vmatpush3.bf16.msra.mxu1 %v1583_v60  ;;  %v3273_v60 = vld [vmem:[%s4185_s2 + $0x84] ss:$8 sps:$4 sm:$0xff]  }
 0x37a   :  { %v1592_v15 = vpack.c.bf16 %v1538_v49, %v1535_v25 }
 0x37c   :  { %2792 = vmatprep.subr.bf16.mxu1 %v1592_v15 }
 0x37d   :  { %2793 = vmatpush3.bf16.msra.mxu1 %v1584_v45  ;;  %v3281_v45 = vld [vmem:[%s4185_s2 + $0xc4] ss:$8 sps:$4 sm:$0xff]  }
 0x37e   :  { %v3036_v61 = vpop.f32.mrb[104].mxu1  ;;  %2794 = vmatprep.subr.bf16.mxu1 %v1593_v9 }
 0x37f   :  { %v1551_v57 = vpop.f32.mrb[105].mxu1 }
 0x380   :  { %v3037_v63 = vpop.f32.mrb[106].mxu1 }
 0x381   :  { %v1595_v51 = vpack.c.bf16 %v3037_v63, %v3036_v61  ;;  %v1554_v42 = vpop.f32.mrb[107].mxu1  ;;  %2795 = vmatpush3.bf16.msra.mxu1 %v1585_v16  ;;  %v3279_v16 = vld [vmem:[%s4185_s2 + $0xb4] ss:$8 sps:$4 sm:$0xff]  }
 0x382   :  { %v1594_v13 = vpack.c.bf16 %v1554_v42, %v1551_v57 }
 0x384   :  { %2796 = vmatprep.subr.bf16.mxu1 %v1594_v13 }
 0x385   :  { %2797 = vmatpush3.bf16.msra.mxu1 %v1586_v43  ;;  %v3285_v43 = vld [vmem:[%s4185_s2 + $0xe4] ss:$8 sps:$4 sm:$0xff]  }
 0x386   :  { %v3040_v47 = vpop.f32.mrb[108].mxu1  ;;  %2798 = vmatprep.subr.bf16.mxu1 %v1595_v51 }
 0x387   :  { %v1567_v50 = vpop.f32.mrb[109].mxu1 }
 0x388   :  { %v3041_v33 = vpop.f32.mrb[110].mxu1 }
 0x389   :  { %v1597_v21 = vpack.c.bf16 %v3041_v33, %v3040_v47  ;;  %v1570_v28 = vpop.f32.mrb[111].mxu1  ;;  %2799 = vmatpush3.bf16.msra.mxu1 %v1587_v29  ;;  %v3252_v29 = vld [vmem:[%s4187_s3 + $0x28] sm:$0xff]  }
 0x38a   :  { %v1596_v18 = vpack.c.bf16 %v1570_v28, %v1567_v50  ;;  %3044 = vmatprep.subr.bf16.mxu0 %v3252_v29 }
 0x38b   :  { %3045 = vmatpush3.bf16.msra.mxu0 %v3252_v29 }
 0x38c   :  { %2800 = vmatprep.subr.bf16.mxu1 %v1596_v18  ;;  %3078 = vmatprep.subr.bf16.mxu0 %v3253_v27 }
 0x38d   :  { %2801 = vmatpush3.bf16.msra.mxu1 %v1588_v36 }
 0x38e   :  { %2802 = vmatprep.subr.bf16.mxu1 %v1597_v21 }
 0x391   :  { %2803 = vmatpush3.bf16.msra.mxu1 %v1589_v22 }
 0x394   :  { %1635 = vmatmul.mubr.bf16.vlgmr.msra.gmra.mrb[112].mxu1 %v3258_v34  ;;  %v3254_v34 = vld [vmem:[%s4187_s3 + $0x38] sm:$0xff]  }
 0x395   :  { %1642 = vmatprep.mubr.bf16.mxu1 %v3259_v19 }
 0x39c   :  { %1643 = vmatmul.mubr.bf16.gmra.mrb[116].mxu1 %v3260_v35 }
 0x39d   :  { %1650 = vmatprep.mubr.bf16.mxu1 %v3261_v7 }
 0x3a4   :  { %1651 = vmatmul.mubr.bf16.gmra.mrb[120].mxu1 %v3262_v37 }
 0x3a5   :  { %1658 = vmatprep.mubr.bf16.mxu1 %v3263_v62 }
 0x3ac   :  { %1659 = vmatmul.mubr.bf16.gmra.mrb[124].mxu1 %v3264_v6 }
 0x3ad   :  { %1666 = vmatprep.mubr.bf16.mxu1 %v3265_v24 }
 0x3b4   :  { %1667 = vmatmul.mubr.bf16.gmra.mrb[128].mxu1 %v3266_v30 }
 0x3b5   :  { %1674 = vmatprep.mubr.bf16.mxu1 %v3267_v32 }
 0x3bc   :  { %1675 = vmatmul.mubr.bf16.gmra.mrb[132].mxu1 %v3268_v38 }
 0x3bd   :  { %1682 = vmatprep.mubr.bf16.mxu1 %v3269_v44 }
 0x3c4   :  { %1683 = vmatmul.mubr.bf16.gmra.mrb[136].mxu1 %v3270_v46 }
 0x3c5   :  { %1690 = vmatprep.mubr.bf16.mxu1 %v3271_v52 }
 0x3cc   :  { %1691 = vmatmul.mubr.bf16.gmra.mrb[140].mxu1 %v3272_v58 }
 0x3cd   :  { %1698 = vmatprep.mubr.bf16.mxu1 %v3273_v60 }
 0x3d4   :  { %1699 = vmatmul.mubr.bf16.gmra.mrb[144].mxu1 %v3274_v17 }
 0x3d5   :  { %1706 = vmatprep.mubr.bf16.mxu1 %v3275_v14 }
 0x3dc   :  { %1707 = vmatmul.mubr.bf16.gmra.mrb[148].mxu1 %v3276_v5 }
 0x3dd   :  { %1714 = vmatprep.mubr.bf16.mxu1 %v3277_v26 }
 0x3e4   :  { %1715 = vmatmul.mubr.bf16.gmra.mrb[152].mxu1 %v3278_v31 }
 0x3e5   :  { %1722 = vmatprep.mubr.bf16.mxu1 %v3279_v16 }
 0x3ec   :  { %1723 = vmatmul.mubr.bf16.gmra.mrb[156].mxu1 %v3280_v40 }
 0x3ed   :  { %1730 = vmatprep.mubr.bf16.mxu1 %v3281_v45 }
 0x3f4   :  { %1731 = vmatmul.mubr.bf16.gmra.mrb[160].mxu1 %v3282_v54 }
 0x3f5   :  { %1738 = vmatprep.mubr.bf16.mxu1 %v3283_v59 }
 0x3fc   :  { %1739 = vmatmul.mubr.bf16.gmra.mrb[164].mxu1 %v3284_v41 }
 0x3fd   :  { %1746 = vmatprep.mubr.bf16.mxu1 %v3285_v43 }
 0x404   :  { %1747 = vmatmul.mubr.bf16.gmra.mrb[168].mxu1 %v3286_v56 }
 0x405   :  { %1754 = vmatprep.mubr.bf16.mxu1 %v3287_v2 }
 0x40c   :  { %1755 = vmatmul.mubr.bf16.gmra.mrb[172].mxu1 %v3288_v8 }
 0x467   :  { %v2804_v22 = vpop.f32.mrb[112].mxu1 }
 0x468   :  { %v2805_v23 = vpop.f32.mrb[113].mxu1 }
 0x469   :  { %v2806_v36 = vadd.f32 %v2805_v23, %v2804_v22  ;;  %v2807_v39 = vpop.f32.mrb[114].mxu1 }
 0x46a   :  { %v2808_v53 = vpop.f32.mrb[115].mxu1 }
 0x46b   :  { %v1637_v1 = vadd.f32 %v2806_v36, %v3554_v10  ;;  %v2809_v12 = vadd.f32 %v2808_v53, %v2807_v39 }
 0x46d   :  { %v1640_v48 = vadd.f32 %v2809_v12, %v3554_v10  ;;  %v1763_v0 = vmax.f32 %v1637_v1, 0.0 }
 0x46f   :  { %v1764_v25 = vmax.f32 %v1640_v48, 0.0  ;;  %v2810_v55 = vpop.f32.mrb[116].mxu1 }
 0x470   :  { %v2811_v9 = vpop.f32.mrb[117].mxu1 }
 0x471   :  { %v1795_v49 = vpack.c.bf16 %v1764_v25, %v1763_v0  ;;  %v2812_v15 = vadd.f32 %v2811_v9, %v2810_v55  ;;  %v2813_v61 = vpop.f32.mrb[118].mxu1 }
 0x472   :  { %v2814_v57 = vpop.f32.mrb[119].mxu1 }
 0x473   :  { %v1645_v63 = vadd.f32 %v2812_v15, %v3554_v10  ;;  %v2815_v51 = vadd.f32 %v2814_v57, %v2813_v61  ;;  %3046 = vmatprep.mubr.msk.bf16.mxu0 %vm1372_vm4, %v1795_v49 }
 0x475   :  { %v1648_v42 = vadd.f32 %v2815_v51, %v3554_v10  ;;  %v1765_v13 = vmax.f32 %v1645_v63, 0.0 }
 0x477   :  { %v1766_v47 = vmax.f32 %v1648_v42, 0.0  ;;  %v2816_v50 = vpop.f32.mrb[120].mxu1 }
 0x478   :  { %v2817_v33 = vpop.f32.mrb[121].mxu1 }
 0x479   :  { %v1796_v21 = vpack.c.bf16 %v1766_v47, %v1765_v13  ;;  %v2818_v28 = vadd.f32 %v2817_v33, %v2816_v50  ;;  %v2819_v18 = vpop.f32.mrb[122].mxu1 }
 0x47a   :  { %v2820_v19 = vpop.f32.mrb[123].mxu1 }
 0x47b   :  { %3047 = vmatmul.mubr.msk.bf16.vlgmr.msra.gmra.mrb[80].mxu0 %vm1372_vm4, %v1796_v21  ;;  %v1653_v35 = vadd.f32 %v2818_v28, %v3554_v10  ;;  %v2821_v7 = vadd.f32 %v2820_v19, %v2819_v18 }
 0x47c   :  { %3079 = vmatpush3.bf16.msra.mxu0 %v3253_v27 }
 0x47d   :  { %v1656_v37 = vadd.f32 %v2821_v7, %v3554_v10  ;;  %3080 = vmatprep.subr.bf16.mxu0 %v3254_v34  ;;  %v1767_v62 = vmax.f32 %v1653_v35, 0.0 }
 0x47f   :  { %v1768_v6 = vmax.f32 %v1656_v37, 0.0  ;;  %v2822_v24 = vpop.f32.mrb[124].mxu1 }
 0x480   :  { %v2823_v30 = vpop.f32.mrb[125].mxu1  ;;  %3081 = vmatpush3.bf16.msra.mxu0 %v3254_v34 }
 0x481   :  { %v1797_v32 = vpack.c.bf16 %v1768_v6, %v1767_v62  ;;  %v2824_v38 = vadd.f32 %v2823_v30, %v2822_v24  ;;  %v2825_v44 = vpop.f32.mrb[126].mxu1 }
 0x482   :  { %v2826_v46 = vpop.f32.mrb[127].mxu1 }
 0x483   :  { %v1661_v52 = vadd.f32 %v2824_v38, %v3554_v10  ;;  %v2827_v58 = vadd.f32 %v2826_v46, %v2825_v44  ;;  %3050 = vmatprep.mubr.msk.bf16.mxu0 %vm1372_vm4, %v1797_v32 }
 0x485   :  { %v1664_v60 = vadd.f32 %v2827_v58, %v3554_v10  ;;  %v1769_v17 = vmax.f32 %v1661_v52, 0.0 }
 0x487   :  { %v1770_v14 = vmax.f32 %v1664_v60, 0.0  ;;  %v2828_v5 = vpop.f32.mrb[128].mxu1 }
 0x488   :  { %v2829_v26 = vpop.f32.mrb[129].mxu1 }
 0x489   :  { %v1798_v31 = vpack.c.bf16 %v1770_v14, %v1769_v17  ;;  %v2830_v16 = vadd.f32 %v2829_v26, %v2828_v5  ;;  %v2831_v40 = vpop.f32.mrb[130].mxu1 }
 0x48a   :  { %v2832_v45 = vpop.f32.mrb[131].mxu1 }
 0x48b   :  { %3051 = vmatmul.mubr.msk.bf16.gmra.mrb[84].mxu0 %vm1372_vm4, %v1798_v31  ;;  %v1669_v20 = vadd.f32 %v2830_v16, %v3554_v10  ;;  %v2833_v54 = vadd.f32 %v2832_v45, %v2831_v40 }
 0x48d   :  { %v1672_v59 = vadd.f32 %v2833_v54, %v3554_v10  ;;  %v1771_v29 = vmax.f32 %v1669_v20, 0.0 }
 0x48f   :  { %v1772_v41 = vmax.f32 %v1672_v59, 0.0  ;;  %v2834_v43 = vpop.f32.mrb[132].mxu1 }
 0x490   :  { %v2835_v56 = vpop.f32.mrb[133].mxu1 }
 0x491   :  { %v1799_v2 = vpack.c.bf16 %v1772_v41, %v1771_v29  ;;  %v2836_v8 = vadd.f32 %v2835_v56, %v2834_v43  ;;  %v2837_v22 = vpop.f32.mrb[134].mxu1 }
 0x492   :  { %v2838_v23 = vpop.f32.mrb[135].mxu1 }
 0x493   :  { %v1677_v36 = vadd.f32 %v2836_v8, %v3554_v10  ;;  %v2839_v39 = vadd.f32 %v2838_v23, %v2837_v22  ;;  %3054 = vmatprep.mubr.msk.bf16.mxu0 %vm1372_vm4, %v1799_v2 }
 0x495   :  { %v1680_v53 = vadd.f32 %v2839_v39, %v3554_v10  ;;  %v1773_v1 = vmax.f32 %v1677_v36, 0.0 }
 0x497   :  { %v1774_v12 = vmax.f32 %v1680_v53, 0.0  ;;  %v2840_v27 = vpop.f32.mrb[136].mxu1 }
 0x498   :  { %v2841_v48 = vpop.f32.mrb[137].mxu1 }
 0x499   :  { %v1800_v0 = vpack.c.bf16 %v1774_v12, %v1773_v1  ;;  %v2842_v25 = vadd.f32 %v2841_v48, %v2840_v27  ;;  %v2843_v55 = vpop.f32.mrb[138].mxu1 }
 0x49a   :  { %v2844_v9 = vpop.f32.mrb[139].mxu1 }
 0x49b   :  { %3055 = vmatmul.mubr.msk.bf16.gmra.mrb[88].mxu0 %vm1372_vm4, %v1800_v0  ;;  %v1685_v49 = vadd.f32 %v2842_v25, %v3554_v10  ;;  %v2845_v15 = vadd.f32 %v2844_v9, %v2843_v55 }
 0x49d   :  { %v1688_v61 = vadd.f32 %v2845_v15, %v3554_v10  ;;  %v1775_v57 = vmax.f32 %v1685_v49, 0.0 }
 0x49f   :  { %v1776_v63 = vmax.f32 %v1688_v61, 0.0  ;;  %v2846_v51 = vpop.f32.mrb[140].mxu1 }
 0x4a0   :  { %v2847_v42 = vpop.f32.mrb[141].mxu1 }
 0x4a1   :  { %v1801_v13 = vpack.c.bf16 %v1776_v63, %v1775_v57  ;;  %v2848_v47 = vadd.f32 %v2847_v42, %v2846_v51  ;;  %v2849_v50 = vpop.f32.mrb[142].mxu1 }
 0x4a2   :  { %v2850_v33 = vpop.f32.mrb[143].mxu1 }
 0x4a3   :  { %v1693_v21 = vadd.f32 %v2848_v47, %v3554_v10  ;;  %v2851_v28 = vadd.f32 %v2850_v33, %v2849_v50  ;;  %3058 = vmatprep.mubr.msk.bf16.mxu0 %vm1372_vm4, %v1801_v13 }
 0x4a5   :  { %v1696_v18 = vadd.f32 %v2851_v28, %v3554_v10  ;;  %v1777_v34 = vmax.f32 %v1693_v21, 0.0  ;;  %v3255_v28 = vld [vmem:[%s4187_s3 + $0x40] sm:$0xff]  }
 0x4a6   :  { %3082 = vmatprep.subr.bf16.mxu0 %v3255_v28 }
 0x4a7   :  { %v1778_v19 = vmax.f32 %v1696_v18, 0.0  ;;  %v2852_v35 = vpop.f32.mrb[144].mxu1  ;;  %3083 = vmatpush3.bf16.msra.mxu0 %v3255_v28 }
 0x4a8   :  { %v2853_v7 = vpop.f32.mrb[145].mxu1 }
 0x4a9   :  { %v1802_v37 = vpack.c.bf16 %v1778_v19, %v1777_v34  ;;  %v2854_v62 = vadd.f32 %v2853_v7, %v2852_v35  ;;  %v2855_v6 = vpop.f32.mrb[146].mxu1 }
 0x4aa   :  { %v2856_v24 = vpop.f32.mrb[147].mxu1 }
 0x4ab   :  { %3059 = vmatmul.mubr.msk.bf16.gmra.mrb[92].mxu0 %vm1372_vm4, %v1802_v37  ;;  %v1701_v30 = vadd.f32 %v2854_v62, %v3554_v10  ;;  %v2857_v32 = vadd.f32 %v2856_v24, %v2855_v6  ;;  %v3256_v6 = vld [vmem:[%s4187_s3 + $0x48] sm:$0xff]  }
 0x4ac   :  { %3084 = vmatprep.subr.bf16.mxu0 %v3256_v6 }
 0x4ad   :  { %v1704_v38 = vadd.f32 %v2857_v32, %v3554_v10  ;;  %v1779_v44 = vmax.f32 %v1701_v30, 0.0  ;;  %3085 = vmatpush3.bf16.msra.mxu0 %v3256_v6 }
 0x4af   :  { %v1780_v46 = vmax.f32 %v1704_v38, 0.0  ;;  %v2858_v52 = vpop.f32.mrb[148].mxu1 }
 0x4b0   :  { %v2859_v58 = vpop.f32.mrb[149].mxu1 }
 0x4b1   :  { %v1803_v60 = vpack.c.bf16 %v1780_v46, %v1779_v44  ;;  %v2860_v17 = vadd.f32 %v2859_v58, %v2858_v52  ;;  %v2861_v14 = vpop.f32.mrb[150].mxu1 }
 0x4b2   :  { %v2862_v5 = vpop.f32.mrb[151].mxu1 }
 0x4b3   :  { %v1709_v26 = vadd.f32 %v2860_v17, %v3554_v10  ;;  %v2863_v31 = vadd.f32 %v2862_v5, %v2861_v14  ;;  %3062 = vmatprep.mubr.msk.bf16.mxu0 %vm1372_vm4, %v1803_v60 }
 0x4b5   :  { %v1712_v16 = vadd.f32 %v2863_v31, %v3554_v10  ;;  %v1781_v40 = vmax.f32 %v1709_v26, 0.0 }
 0x4b7   :  { %v1782_v45 = vmax.f32 %v1712_v16, 0.0  ;;  %v2864_v20 = vpop.f32.mrb[152].mxu1 }
 0x4b8   :  { %v2865_v54 = vpop.f32.mrb[153].mxu1 }
 0x4b9   :  { %v1804_v59 = vpack.c.bf16 %v1782_v45, %v1781_v40  ;;  %v2866_v29 = vadd.f32 %v2865_v54, %v2864_v20  ;;  %v2867_v41 = vpop.f32.mrb[154].mxu1 }
 0x4ba   :  { %v2868_v43 = vpop.f32.mrb[155].mxu1 }
 0x4bb   :  { %3063 = vmatmul.mubr.msk.bf16.gmra.mrb[96].mxu0 %vm1372_vm4, %v1804_v59  ;;  %v1717_v56 = vadd.f32 %v2866_v29, %v3554_v10  ;;  %v2869_v2 = vadd.f32 %v2868_v43, %v2867_v41 }
 0x4bd   :  { %v1720_v8 = vadd.f32 %v2869_v2, %v3554_v10  ;;  %v1783_v22 = vmax.f32 %v1717_v56, 0.0 }
 0x4bf   :  { %v1784_v23 = vmax.f32 %v1720_v8, 0.0  ;;  %v2870_v36 = vpop.f32.mrb[156].mxu1 }
 0x4c0   :  { %v2871_v39 = vpop.f32.mrb[157].mxu1 }
 0x4c1   :  { %v1805_v53 = vpack.c.bf16 %v1784_v23, %v1783_v22  ;;  %v2872_v1 = vadd.f32 %v2871_v39, %v2870_v36  ;;  %v2873_v12 = vpop.f32.mrb[158].mxu1  ;;  %v1813_v22 = vsub.s32 2, %v3544_v4  ;;  %v4200_v23 = vunpack.c.l.bf16 %v3542_v3 }
 0x4c2   :  { %v2874_v27 = vpop.f32.mrb[159].mxu1 }
 0x4c3   :  { %v1725_v48 = vadd.f32 %v2872_v1, %v3554_v10  ;;  %v2875_v0 = vadd.f32 %v2874_v27, %v2873_v12  ;;  %3066 = vmatprep.mubr.msk.bf16.mxu0 %vm1372_vm4, %v1805_v53  ;;  %v3974_v36 = vrot.slane %v4200_v23, %v1813_v22 }
 0x4c5   :  { %v1728_v25 = vadd.f32 %v2875_v0, %v3554_v10  ;;  %v1785_v55 = vmax.f32 %v1725_v48, 0.0 }
 0x4c7   :  { %v1786_v9 = vmax.f32 %v1728_v25, 0.0  ;;  %v2876_v49 = vpop.f32.mrb[160].mxu1 }
 0x4c8   :  { %v2877_v15 = vpop.f32.mrb[161].mxu1 }
 0x4c9   :  { %v1806_v61 = vpack.c.bf16 %v1786_v9, %v1785_v55  ;;  %v2878_v57 = vadd.f32 %v2877_v15, %v2876_v49  ;;  %v2879_v63 = vpop.f32.mrb[162].mxu1 }
 0x4ca   :  { %v2880_v51 = vpop.f32.mrb[163].mxu1 }
 0x4cb   :  { %3067 = vmatmul.mubr.msk.bf16.gmra.mrb[100].mxu0 %vm1372_vm4, %v1806_v61  ;;  %v1733_v42 = vadd.f32 %v2878_v57, %v3554_v10  ;;  %v2881_v13 = vadd.f32 %v2880_v51, %v2879_v63 }
 0x4cd   :  { %v1736_v47 = vadd.f32 %v2881_v13, %v3554_v10  ;;  %v1787_v50 = vmax.f32 %v1733_v42, 0.0 }
 0x4cf   :  { %v1788_v33 = vmax.f32 %v1736_v47, 0.0  ;;  %v2882_v21 = vpop.f32.mrb[164].mxu1 }
 0x4d0   :  { %v2883_v18 = vpop.f32.mrb[165].mxu1 }
 0x4d1   :  { %v1807_v34 = vpack.c.bf16 %v1788_v33, %v1787_v50  ;;  %v2884_v19 = vadd.f32 %v2883_v18, %v2882_v21  ;;  %v2885_v35 = vpop.f32.mrb[166].mxu1 }
 0x4d2   :  { %v2886_v7 = vpop.f32.mrb[167].mxu1 }
 0x4d3   :  { %v1741_v37 = vadd.f32 %v2884_v19, %v3554_v10  ;;  %v2887_v62 = vadd.f32 %v2886_v7, %v2885_v35  ;;  %3070 = vmatprep.mubr.msk.bf16.mxu0 %vm1372_vm4, %v1807_v34 }
 0x4d5   :  { %v1744_v24 = vadd.f32 %v2887_v62, %v3554_v10  ;;  %v1789_v30 = vmax.f32 %v1741_v37, 0.0 }
 0x4d7   :  { %v1790_v32 = vmax.f32 %v1744_v24, 0.0  ;;  %v2888_v38 = vpop.f32.mrb[168].mxu1 }
 0x4d8   :  { %v2889_v44 = vpop.f32.mrb[169].mxu1 }
 0x4d9   :  { %v1808_v46 = vpack.c.bf16 %v1790_v32, %v1789_v30  ;;  %v2890_v52 = vadd.f32 %v2889_v44, %v2888_v38  ;;  %v2891_v58 = vpop.f32.mrb[170].mxu1 }
 0x4da   :  { %v2892_v60 = vpop.f32.mrb[171].mxu1 }
 0x4db   :  { %3071 = vmatmul.mubr.msk.bf16.gmra.mrb[104].mxu0 %vm1372_vm4, %v1808_v46  ;;  %v1749_v17 = vadd.f32 %v2890_v52, %v3554_v10  ;;  %v2893_v14 = vadd.f32 %v2892_v60, %v2891_v58 }
 0x4dd   :  { %v1752_v5 = vadd.f32 %v2893_v14, %v3554_v10  ;;  %v1791_v26 = vmax.f32 %v1749_v17, 0.0 }
 0x4df   :  { %v1792_v31 = vmax.f32 %v1752_v5, 0.0  ;;  %v2894_v16 = vpop.f32.mrb[172].mxu1 }
 0x4e0   :  { %v2895_v40 = vpop.f32.mrb[173].mxu1 }
 0x4e1   :  { %v1809_v45 = vpack.c.bf16 %v1792_v31, %v1791_v26  ;;  %v2896_v20 = vadd.f32 %v2895_v40, %v2894_v16  ;;  %v2897_v54 = vpop.f32.mrb[174].mxu1 }
 0x4e2   :  { %v2898_v59 = vpop.f32.mrb[175].mxu1 }
 0x4e3   :  { %v1757_v29 = vadd.f32 %v2896_v20, %v3554_v10  ;;  %v2899_v41 = vadd.f32 %v2898_v59, %v2897_v54  ;;  %3074 = vmatprep.mubr.msk.bf16.mxu0 %vm1372_vm4, %v1809_v45 }
 0x4e5   :  { %v1760_v43 = vadd.f32 %v2899_v41, %v3554_v10  ;;  %v1793_v56 = vmax.f32 %v1757_v29, 0.0 }
 0x4e7   :  { %v1794_v2 = vmax.f32 %v1760_v43, 0.0 }
 0x4e9   :  { %v1810_v8 = vpack.c.bf16 %v1794_v2, %v1793_v56 }
 0x4eb   :  { %3075 = vmatmul.mubr.msk.bf16.gmra.mrb[108].mxu0 %vm1372_vm4, %v1810_v8 }
 0x54e   :  { %v3048_v39 = vpop.f32.mrb[80].mxu0 }
 0x54f   :  { %v1918_v53 = vadd.f32 %v3048_v39, %v3974_v36  ;;  %v1909_v1 = vpop.f32.mrb[81].mxu0 }
 0x550   :  { %v1910_v12 = vadd.f32 %v1909_v1, %v3974_v36  ;;  %v3049_v27 = vpop.f32.mrb[82].mxu0 }
 0x551   :  { %v1921_v10 = vadd.f32 %v3049_v27, %v3974_v36  ;;  %v1912_v48 = vpop.f32.mrb[83].mxu0  ;;  %v2038_v25 = vmax.f32 %v1918_v53, 0.0 }
 0x552   :  { %v1913_v0 = vadd.f32 %v1912_v48, %v3974_v36  ;;  %v2036_v9 = vmax.f32 %v1910_v12, 0.0 }
 0x553   :  { %v2039_v55 = vmax.f32 %v1921_v10, 0.0 }
 0x554   :  { %v2037_v4 = vmax.f32 %v1913_v0, 0.0 }
 0x555   :  { %v2069_v49 = vpack.c.bf16 %v2039_v55, %v2038_v25 }
 0x556   :  { %v2068_v3 = vpack.c.bf16 %v2037_v4, %v2036_v9 }
 0x558   :  { %3086 = vmatprep.mubr.msk.bf16.mxu0 %vm2112_vm5, %v2068_v3 }
 0x559   :  { %3087 = vmatmul.mubr.msk.bf16.vlgmr.msra.gmra.mrb[112].mxu0 %vm2112_vm5, %v2069_v49 }
 0x55e   :  { %v3052_v15 = vpop.f32.mrb[84].mxu0 }
 0x55f   :  { %v1934_v61 = vadd.f32 %v3052_v15, %v3974_v36  ;;  %v1925_v57 = vpop.f32.mrb[85].mxu0 }
 0x560   :  { %v1926_v63 = vadd.f32 %v1925_v57, %v3974_v36  ;;  %v3053_v51 = vpop.f32.mrb[86].mxu0 }
 0x561   :  { %v1937_v42 = vadd.f32 %v3053_v51, %v3974_v36  ;;  %v1928_v13 = vpop.f32.mrb[87].mxu0  ;;  %v2042_v50 = vmax.f32 %v1934_v61, 0.0 }
 0x562   :  { %v1929_v47 = vadd.f32 %v1928_v13, %v3974_v36  ;;  %v2040_v21 = vmax.f32 %v1926_v63, 0.0 }
 0x563   :  { %v2043_v33 = vmax.f32 %v1937_v42, 0.0 }
 0x564   :  { %v2041_v28 = vmax.f32 %v1929_v47, 0.0 }
 0x565   :  { %v2071_v18 = vpack.c.bf16 %v2043_v33, %v2042_v50 }
 0x566   :  { %v2070_v34 = vpack.c.bf16 %v2041_v28, %v2040_v21 }
 0x568   :  { %3090 = vmatprep.mubr.msk.bf16.mxu0 %vm2112_vm5, %v2070_v34 }
 0x569   :  { %3091 = vmatmul.mubr.msk.bf16.gmra.mrb[116].mxu0 %vm2112_vm5, %v2071_v18 }
 0x56e   :  { %v3056_v19 = vpop.f32.mrb[88].mxu0 }
 0x56f   :  { %v1950_v35 = vadd.f32 %v3056_v19, %v3974_v36  ;;  %v1941_v7 = vpop.f32.mrb[89].mxu0 }
 0x570   :  { %v1942_v37 = vadd.f32 %v1941_v7, %v3974_v36  ;;  %v3057_v62 = vpop.f32.mrb[90].mxu0 }
 0x571   :  { %v1953_v6 = vadd.f32 %v3057_v62, %v3974_v36  ;;  %v1944_v24 = vpop.f32.mrb[91].mxu0  ;;  %v2046_v32 = vmax.f32 %v1950_v35, 0.0 }
 0x572   :  { %v1945_v30 = vadd.f32 %v1944_v24, %v3974_v36  ;;  %v2044_v44 = vmax.f32 %v1942_v37, 0.0 }
 0x573   :  { %v2047_v38 = vmax.f32 %v1953_v6, 0.0 }
 0x574   :  { %v2045_v46 = vmax.f32 %v1945_v30, 0.0 }
 0x575   :  { %v2073_v52 = vpack.c.bf16 %v2047_v38, %v2046_v32 }
 0x576   :  { %v2072_v58 = vpack.c.bf16 %v2045_v46, %v2044_v44 }
 0x578   :  { %3094 = vmatprep.mubr.msk.bf16.mxu0 %vm2112_vm5, %v2072_v58 }
 0x579   :  { %3095 = vmatmul.mubr.msk.bf16.gmra.mrb[120].mxu0 %vm2112_vm5, %v2073_v52 }
 0x57e   :  { %v3060_v60 = vpop.f32.mrb[92].mxu0 }
 0x57f   :  { %v1966_v17 = vadd.f32 %v3060_v60, %v3974_v36  ;;  %v1957_v14 = vpop.f32.mrb[93].mxu0 }
 0x580   :  { %v1958_v5 = vadd.f32 %v1957_v14, %v3974_v36  ;;  %v3061_v26 = vpop.f32.mrb[94].mxu0 }
 0x581   :  { %v1969_v31 = vadd.f32 %v3061_v26, %v3974_v36  ;;  %v1960_v16 = vpop.f32.mrb[95].mxu0  ;;  %v2050_v45 = vmax.f32 %v1966_v17, 0.0 }
 0x582   :  { %v1961_v40 = vadd.f32 %v1960_v16, %v3974_v36  ;;  %v2048_v54 = vmax.f32 %v1958_v5, 0.0 }
 0x583   :  { %v2051_v20 = vmax.f32 %v1969_v31, 0.0 }
 0x584   :  { %v2049_v59 = vmax.f32 %v1961_v40, 0.0 }
 0x585   :  { %v2075_v29 = vpack.c.bf16 %v2051_v20, %v2050_v45 }
 0x586   :  { %v2074_v41 = vpack.c.bf16 %v2049_v59, %v2048_v54 }
 0x588   :  { %3098 = vmatprep.mubr.msk.bf16.mxu0 %vm2112_vm5, %v2074_v41 }
 0x589   :  { %3099 = vmatmul.mubr.msk.bf16.gmra.mrb[124].mxu0 %vm2112_vm5, %v2075_v29 }
 0x58e   :  { %v3064_v43 = vpop.f32.mrb[96].mxu0 }
 0x58f   :  { %v1982_v56 = vadd.f32 %v3064_v43, %v3974_v36  ;;  %v1973_v2 = vpop.f32.mrb[97].mxu0 }
 0x590   :  { %v1974_v8 = vadd.f32 %v1973_v2, %v3974_v36  ;;  %v3065_v22 = vpop.f32.mrb[98].mxu0 }
 0x591   :  { %v1985_v23 = vadd.f32 %v3065_v22, %v3974_v36  ;;  %v1976_v39 = vpop.f32.mrb[99].mxu0  ;;  %v2054_v1 = vmax.f32 %v1982_v56, 0.0 }
 0x592   :  { %v1977_v53 = vadd.f32 %v1976_v39, %v3974_v36  ;;  %v2052_v27 = vmax.f32 %v1974_v8, 0.0 }
 0x593   :  { %v2055_v12 = vmax.f32 %v1985_v23, 0.0 }
 0x594   :  { %v2053_v10 = vmax.f32 %v1977_v53, 0.0 }
 0x595   :  { %v2077_v48 = vpack.c.bf16 %v2055_v12, %v2054_v1 }
 0x596   :  { %v2076_v0 = vpack.c.bf16 %v2053_v10, %v2052_v27 }
 0x598   :  { %3102 = vmatprep.mubr.msk.bf16.mxu0 %vm2112_vm5, %v2076_v0 }
 0x599   :  { %3103 = vmatmul.mubr.msk.bf16.gmra.mrb[128].mxu0 %vm2112_vm5, %v2077_v48 }
 0x59e   :  { %v3068_v25 = vpop.f32.mrb[100].mxu0 }
 0x59f   :  { %v1998_v55 = vadd.f32 %v3068_v25, %v3974_v36  ;;  %v1989_v9 = vpop.f32.mrb[101].mxu0 }
 0x5a0   :  { %v1990_v4 = vadd.f32 %v1989_v9, %v3974_v36  ;;  %v3069_v49 = vpop.f32.mrb[102].mxu0 }
 0x5a1   :  { %v2001_v3 = vadd.f32 %v3069_v49, %v3974_v36  ;;  %v1992_v15 = vpop.f32.mrb[103].mxu0  ;;  %v2058_v57 = vmax.f32 %v1998_v55, 0.0 }
 0x5a2   :  { %v1993_v61 = vadd.f32 %v1992_v15, %v3974_v36  ;;  %v2056_v51 = vmax.f32 %v1990_v4, 0.0 }
 0x5a3   :  { %v2059_v63 = vmax.f32 %v2001_v3, 0.0 }
 0x5a4   :  { %v2057_v42 = vmax.f32 %v1993_v61, 0.0 }
 0x5a5   :  { %v2079_v13 = vpack.c.bf16 %v2059_v63, %v2058_v57 }
 0x5a6   :  { %v2078_v47 = vpack.c.bf16 %v2057_v42, %v2056_v51 }
 0x5a8   :  { %3106 = vmatprep.mubr.msk.bf16.mxu0 %vm2112_vm5, %v2078_v47 }
 0x5a9   :  { %3107 = vmatmul.mubr.msk.bf16.gmra.mrb[132].mxu0 %vm2112_vm5, %v2079_v13 }
 0x5ae   :  { %v3072_v50 = vpop.f32.mrb[104].mxu0 }
 0x5af   :  { %v2014_v33 = vadd.f32 %v3072_v50, %v3974_v36  ;;  %v2005_v21 = vpop.f32.mrb[105].mxu0 }
 0x5b0   :  { %v2006_v28 = vadd.f32 %v2005_v21, %v3974_v36  ;;  %v3073_v18 = vpop.f32.mrb[106].mxu0 }
 0x5b1   :  { %v2017_v34 = vadd.f32 %v3073_v18, %v3974_v36  ;;  %v2008_v19 = vpop.f32.mrb[107].mxu0  ;;  %v2062_v7 = vmax.f32 %v2014_v33, 0.0 }
 0x5b2   :  { %v2009_v35 = vadd.f32 %v2008_v19, %v3974_v36  ;;  %v2060_v62 = vmax.f32 %v2006_v28, 0.0 }
 0x5b3   :  { %v2063_v37 = vmax.f32 %v2017_v34, 0.0 }
 0x5b4   :  { %v2061_v6 = vmax.f32 %v2009_v35, 0.0 }
 0x5b5   :  { %v2081_v24 = vpack.c.bf16 %v2063_v37, %v2062_v7 }
 0x5b6   :  { %v2080_v30 = vpack.c.bf16 %v2061_v6, %v2060_v62 }
 0x5b8   :  { %3110 = vmatprep.mubr.msk.bf16.mxu0 %vm2112_vm5, %v2080_v30 }
 0x5b9   :  { %3111 = vmatmul.mubr.msk.bf16.gmra.mrb[136].mxu0 %vm2112_vm5, %v2081_v24 }
 0x5be   :  { %v3076_v32 = vpop.f32.mrb[108].mxu0 }
 0x5bf   :  { %v2030_v38 = vadd.f32 %v3076_v32, %v3974_v36  ;;  %v2021_v44 = vpop.f32.mrb[109].mxu0 }
 0x5c0   :  { %v2022_v46 = vadd.f32 %v2021_v44, %v3974_v36  ;;  %v3077_v52 = vpop.f32.mrb[110].mxu0 }
 0x5c1   :  { %v2033_v58 = vadd.f32 %v3077_v52, %v3974_v36  ;;  %v2024_v60 = vpop.f32.mrb[111].mxu0  ;;  %v2066_v14 = vmax.f32 %v2030_v38, 0.0 }
 0x5c2   :  { %v2025_v17 = vadd.f32 %v2024_v60, %v3974_v36  ;;  %v2064_v26 = vmax.f32 %v2022_v46, 0.0 }
 0x5c3   :  { %v2067_v5 = vmax.f32 %v2033_v58, 0.0 }
 0x5c4   :  { %v2065_v31 = vmax.f32 %v2025_v17, 0.0 }
 0x5c5   :  { %v2083_v16 = vpack.c.bf16 %v2067_v5, %v2066_v14 }
 0x5c6   :  { %v2082_v40 = vpack.c.bf16 %v2065_v31, %v2064_v26 }
 0x5c8   :  { %3114 = vmatprep.mubr.msk.bf16.mxu0 %vm2112_vm5, %v2082_v40 }
 0x5c9   :  { %3115 = vmatmul.mubr.msk.bf16.gmra.mrb[140].mxu0 %vm2112_vm5, %v2083_v16 }
 0x62c   :  { %v3088_v45 = vpop.f32.mrb[112].mxu0 }
 0x62d   :  { %v2204_v20 = vadd.f32 %v3088_v45, %v3558_v11  ;;  %v2195_v54 = vpop.f32.mrb[113].mxu0 }
 0x62e   :  { %v2196_v59 = vadd.f32 %v2195_v54, %v3558_v11  ;;  %v3089_v29 = vpop.f32.mrb[114].mxu0 }
 0x62f   :  { %2325 = vst.msk [vmem:[%s4188_s4 + $0x10] sm:$0xff] %vm2322_vm6, %v2204_v20  ;;  %v2207_v36 = vadd.f32 %v3089_v29, %v3558_v11  ;;  %v2198_v41 = vpop.f32.mrb[115].mxu0 }
 0x630   :  { %2323 = vst.msk [vmem:[%s4188_s4] sm:$0xff] %vm2322_vm6, %v2196_v59  ;;  %v2199_v43 = vadd.f32 %v2198_v41, %v3558_v11 }
 0x631   :  { %2326 = vst.msk [vmem:[%s4188_s4 + $0x18] sm:$0xff] %vm2322_vm6, %v2207_v36 }
 0x632   :  { %2324 = vst.msk [vmem:[%s4188_s4 + $0x8] sm:$0xff] %vm2322_vm6, %v2199_v43 }
 0x63c   :  { %v3092_v56 = vpop.f32.mrb[116].mxu0 }
 0x63d   :  { %v2220_v2 = vadd.f32 %v3092_v56, %v3558_v11  ;;  %v2211_v8 = vpop.f32.mrb[117].mxu0 }
 0x63e   :  { %v2212_v22 = vadd.f32 %v2211_v8, %v3558_v11  ;;  %v3093_v23 = vpop.f32.mrb[118].mxu0 }
 0x63f   :  { %2329 = vst.msk [vmem:[%s4188_s4 + $0x30] sm:$0xff] %vm2322_vm6, %v2220_v2  ;;  %v2223_v39 = vadd.f32 %v3093_v23, %v3558_v11  ;;  %v2214_v53 = vpop.f32.mrb[119].mxu0 }
 0x640   :  { %2327 = vst.msk [vmem:[%s4188_s4 + $0x20] sm:$0xff] %vm2322_vm6, %v2212_v22  ;;  %v2215_v1 = vadd.f32 %v2214_v53, %v3558_v11 }
 0x641   :  { %2330 = vst.msk [vmem:[%s4188_s4 + $0x38] sm:$0xff] %vm2322_vm6, %v2223_v39 }
 0x642   :  { %2328 = vst.msk [vmem:[%s4188_s4 + $0x28] sm:$0xff] %vm2322_vm6, %v2215_v1 }
 0x64c   :  { %v3096_v12 = vpop.f32.mrb[120].mxu0 }
 0x64d   :  { %v2236_v27 = vadd.f32 %v3096_v12, %v3558_v11  ;;  %v2227_v10 = vpop.f32.mrb[121].mxu0 }
 0x64e   :  { %v2228_v48 = vadd.f32 %v2227_v10, %v3558_v11  ;;  %v3097_v0 = vpop.f32.mrb[122].mxu0 }
 0x64f   :  { %2333 = vst.msk [vmem:[%s4188_s4 + $0x50] sm:$0xff] %vm2322_vm6, %v2236_v27  ;;  %v2239_v25 = vadd.f32 %v3097_v0, %v3558_v11  ;;  %v2230_v55 = vpop.f32.mrb[123].mxu0 }
 0x650   :  { %2331 = vst.msk [vmem:[%s4188_s4 + $0x40] sm:$0xff] %vm2322_vm6, %v2228_v48  ;;  %v2231_v9 = vadd.f32 %v2230_v55, %v3558_v11 }
 0x651   :  { %2334 = vst.msk [vmem:[%s4188_s4 + $0x58] sm:$0xff] %vm2322_vm6, %v2239_v25 }
 0x652   :  { %2332 = vst.msk [vmem:[%s4188_s4 + $0x48] sm:$0xff] %vm2322_vm6, %v2231_v9 }
 0x65c   :  { %v3100_v4 = vpop.f32.mrb[124].mxu0 }
 0x65d   :  { %v2252_v49 = vadd.f32 %v3100_v4, %v3558_v11  ;;  %v2243_v3 = vpop.f32.mrb[125].mxu0 }
 0x65e   :  { %v2244_v15 = vadd.f32 %v2243_v3, %v3558_v11  ;;  %v3101_v61 = vpop.f32.mrb[126].mxu0 }
 0x65f   :  { %2337 = vst.msk [vmem:[%s4188_s4 + $0x70] sm:$0xff] %vm2322_vm6, %v2252_v49  ;;  %v2255_v57 = vadd.f32 %v3101_v61, %v3558_v11  ;;  %v2246_v63 = vpop.f32.mrb[127].mxu0 }
 0x660   :  { %2335 = vst.msk [vmem:[%s4188_s4 + $0x60] sm:$0xff] %vm2322_vm6, %v2244_v15  ;;  %v2247_v51 = vadd.f32 %v2246_v63, %v3558_v11 }
 0x661   :  { %2338 = vst.msk [vmem:[%s4188_s4 + $0x78] sm:$0xff] %vm2322_vm6, %v2255_v57 }
 0x662   :  { %2336 = vst.msk [vmem:[%s4188_s4 + $0x68] sm:$0xff] %vm2322_vm6, %v2247_v51 }
 0x66c   :  { %v3104_v42 = vpop.f32.mrb[128].mxu0 }
 0x66d   :  { %v2268_v13 = vadd.f32 %v3104_v42, %v3558_v11  ;;  %v2259_v47 = vpop.f32.mrb[129].mxu0 }
 0x66e   :  { %v2260_v50 = vadd.f32 %v2259_v47, %v3558_v11  ;;  %v3105_v33 = vpop.f32.mrb[130].mxu0 }
 0x66f   :  { %2341 = vst.msk [vmem:[%s4188_s4 + $0x90] sm:$0xff] %vm2322_vm6, %v2268_v13  ;;  %v2271_v21 = vadd.f32 %v3105_v33, %v3558_v11  ;;  %v2262_v28 = vpop.f32.mrb[131].mxu0 }
 0x670   :  { %2339 = vst.msk [vmem:[%s4188_s4 + $0x80] sm:$0xff] %vm2322_vm6, %v2260_v50  ;;  %v2263_v18 = vadd.f32 %v2262_v28, %v3558_v11 }
 0x671   :  { %2342 = vst.msk [vmem:[%s4188_s4 + $0x98] sm:$0xff] %vm2322_vm6, %v2271_v21 }
 0x672   :  { %2340 = vst.msk [vmem:[%s4188_s4 + $0x88] sm:$0xff] %vm2322_vm6, %v2263_v18 }
 0x67c   :  { %v3108_v34 = vpop.f32.mrb[132].mxu0 }
 0x67d   :  { %v2284_v19 = vadd.f32 %v3108_v34, %v3558_v11  ;;  %v2275_v35 = vpop.f32.mrb[133].mxu0 }
 0x67e   :  { %v2276_v7 = vadd.f32 %v2275_v35, %v3558_v11  ;;  %v3109_v37 = vpop.f32.mrb[134].mxu0 }
 0x67f   :  { %2345 = vst.msk [vmem:[%s4188_s4 + $0xb0] sm:$0xff] %vm2322_vm6, %v2284_v19  ;;  %v2287_v62 = vadd.f32 %v3109_v37, %v3558_v11  ;;  %v2278_v6 = vpop.f32.mrb[135].mxu0 }
 0x680   :  { %2343 = vst.msk [vmem:[%s4188_s4 + $0xa0] sm:$0xff] %vm2322_vm6, %v2276_v7  ;;  %v2279_v24 = vadd.f32 %v2278_v6, %v3558_v11 }
 0x681   :  { %2346 = vst.msk [vmem:[%s4188_s4 + $0xb8] sm:$0xff] %vm2322_vm6, %v2287_v62 }
 0x682   :  { %2344 = vst.msk [vmem:[%s4188_s4 + $0xa8] sm:$0xff] %vm2322_vm6, %v2279_v24 }
 0x68c   :  { %v3112_v30 = vpop.f32.mrb[136].mxu0 }
 0x68d   :  { %v2300_v32 = vadd.f32 %v3112_v30, %v3558_v11  ;;  %v2291_v38 = vpop.f32.mrb[137].mxu0 }
 0x68e   :  { %v2292_v44 = vadd.f32 %v2291_v38, %v3558_v11  ;;  %v3113_v46 = vpop.f32.mrb[138].mxu0 }
 0x68f   :  { %2349 = vst.msk [vmem:[%s4188_s4 + $0xd0] sm:$0xff] %vm2322_vm6, %v2300_v32  ;;  %v2303_v52 = vadd.f32 %v3113_v46, %v3558_v11  ;;  %v2294_v58 = vpop.f32.mrb[139].mxu0 }
 0x690   :  { %2347 = vst.msk [vmem:[%s4188_s4 + $0xc0] sm:$0xff] %vm2322_vm6, %v2292_v44  ;;  %v2295_v60 = vadd.f32 %v2294_v58, %v3558_v11 }
 0x691   :  { %2350 = vst.msk [vmem:[%s4188_s4 + $0xd8] sm:$0xff] %vm2322_vm6, %v2303_v52 }
 0x692   :  { %2348 = vst.msk [vmem:[%s4188_s4 + $0xc8] sm:$0xff] %vm2322_vm6, %v2295_v60 }
 0x69c   :  { %v3116_v17 = vpop.f32.mrb[140].mxu0 }
 0x69d   :  { %v2316_v14 = vadd.f32 %v3116_v17, %v3558_v11  ;;  %v2307_v5 = vpop.f32.mrb[141].mxu0 }
 0x69e   :  { %v2308_v26 = vadd.f32 %v2307_v5, %v3558_v11  ;;  %v3117_v31 = vpop.f32.mrb[142].mxu0 }
 0x69f   :  { %2353 = vst.msk [vmem:[%s4188_s4 + $0xf0] sm:$0xff] %vm2322_vm6, %v2316_v14  ;;  %v2319_v16 = vadd.f32 %v3117_v31, %v3558_v11  ;;  %v2310_v40 = vpop.f32.mrb[143].mxu0 }
 0x6a0   :  { %2351 = vst.msk [vmem:[%s4188_s4 + $0xe0] sm:$0xff] %vm2322_vm6, %v2308_v26  ;;  %v2311_v45 = vadd.f32 %v2310_v40, %v3558_v11 }
 0x6a1   :  { %2354 = vst.msk [vmem:[%s4188_s4 + $0xf8] sm:$0xff] %vm2322_vm6, %v2319_v16 }
 0x6a2   :  { %2352 = vst.msk [vmem:[%s4188_s4 + $0xe8] sm:$0xff] %vm2322_vm6, %v2311_v45 }

</bundles_post_ra>
